<compile_context>
chip_gen: v6e
topology: v6e:2x2x1
jax: 0.10.0
libtpu: 0.0.40
codegen_flags: <defaults>
</compile_context>

<pallas_src>
import functools

import jax
import jax.numpy as jnp
from jax.experimental import pallas as pl
from jax.experimental.pallas import tpu as pltpu


def _round_up(x, m):
    return (x + m - 1) // m * m


def _num_tensorcores():
    """Best-effort TensorCores-per-device (2 on megacore chips like v7x)."""
    try:
        n = getattr(jax.devices()[0], "num_cores", None)
        return max(1, int(n)) if n else 1
    except Exception:
        return 1


def _critic_kernel(s_ref, a_ref, w1_ref, b1_ref, w2s_ref, w2a_ref, b2_ref,
                   w3_ref, o_ref, *, action_on_vpu):
    cdt = w1_ref.dtype

    # fcs1: xs = relu(state @ W1 + b1)   (f32 accumulate on the MXU)
    s = s_ref[...].astype(cdt)
    xs = jnp.dot(s, w1_ref[...], preferred_element_type=jnp.float32)
    xs = jnp.maximum(xs + b1_ref[...], 0.0)

    # fc2 on cat(xs, action): h = relu(xs @ W2s + a @ W2a + b2)
    h = jnp.dot(xs.astype(cdt), w2s_ref[...],
                preferred_element_type=jnp.float32)
    a = a_ref[...].astype(jnp.float32)
    w2a = w2a_ref[...]                              # small (A, H2p) f32 weight
    if action_on_vpu:
        # K = action_size is tiny: a handful of broadcast multiply-adds on the
        # VPU instead of a second (mostly empty) MXU pass + result drain.
        for k in range(a.shape[1]):
            h = h + a[:, k:k + 1] * w2a[k:k + 1, :]
    else:
        h = h + jnp.dot(a, w2a, preferred_element_type=jnp.float32)
    h = jnp.maximum(h + b2_ref[...], 0.0)

    # fc3: output width 1 -> VPU multiply + lane reduce (XLU), no MXU pass.
    q = jnp.sum(h * w3_ref[...], axis=-1, keepdims=True)   # (tile_b, 1)
    o_ref[...] = q.astype(o_ref.dtype)


def prepare_critic_params(params, *, compute_dtype=jnp.bfloat16, lane=128):
    """Pad hidden dims to lane multiples, cast the two big MXU weights to
    compute_dtype (bf16 default), keep everything elementwise-facing in f32,
    and lay fc3's weight out as a (1, H2p) row.

    Zero padding is exact: padded columns see zero weights/biases, stay 0
    through ReLU, and contribute nothing downstream.
    """
    w1, b1, w2s, w2a, b2, w3, b3 = params
    S, H1 = w1.shape
    A = w2a.shape[0]
    H2 = w2s.shape[1]
    H1p = _round_up(H1, lane)
    H2p = _round_up(H2, lane)
    f32 = jnp.float32

    w1p = jnp.zeros((S, H1p), f32).at[:, :H1].set(w1).astype(compute_dtype)
    b1p = jnp.zeros((1, H1p), f32).at[:, :H1].set(b1)
    w2sp = jnp.zeros((H1p, H2p), f32).at[:H1, :H2].set(w2s).astype(compute_dtype)
    # W2's action part stays f32: it is consumed by the VPU fma path.
    w2ap = jnp.zeros((A, H2p), f32).at[:, :H2].set(w2a)
    b2p = jnp.zeros((1, H2p), f32).at[:, :H2].set(b2)
    w3p = jnp.zeros((1, H2p), f32).at[:, :H2].set(w3.reshape(1, H2))
    return (w1p, b1p, w2sp, w2ap, b2p, w3p, b3.astype(f32))


def critic_forward(state, action, prepared_params, *, max_tile_b=256,
                   vpu_action_threshold=8):
    """state: (B, state_size), action: (B, action_size) -> (B, 1) f32 Q-values.

    max_tile_b: raise to 512 on single-TC v5e/v6e for very large replay
    batches (weights are resident across grid steps; larger tiles amortize the
    ~0.35 us per-step overhead).  Keep 128-256 on v7x so both TCs get work.
    """
    w1, b1, w2s, w2a, b2, w3, b3 = prepared_params
    B, S = state.shape
    A = action.shape[1]
    H1p = w1.shape[1]
    H2p = w2s.shape[1]
    cdt = w1.dtype

    # Batch tiling.  `mult` keeps the batch block a legal sublane multiple.
    mult = 16 if jnp.dtype(cdt).itemsize < 4 else 8
    num_tc = _num_tensorcores()
    if num_tc >= 2 and B >= 256:
        # Megacore (v7x): ensure >= num_tc "parallel" grid steps.
        tile_b = min(max_tile_b, _round_up(pl.cdiv(B, num_tc), mult))
    elif B <= max_tile_b:
        tile_b = _round_up(B, mult)       # one big tile, no grid-loop overhead
    else:
        tile_b = max_tile_b
    grid = (pl.cdiv(B, tile_b),)          # edge block is clipped by Pallas

    action_on_vpu = A <= vpu_action_threshold
    kernel = functools.partial(_critic_kernel, action_on_vpu=action_on_vpu)

    in_specs = [
        pl.BlockSpec((tile_b, S), lambda i: (i, 0)),    # state tile
        pl.BlockSpec((tile_b, A), lambda i: (i, 0)),    # action tile
        pl.BlockSpec((S, H1p), lambda i: (0, 0)),       # W1 (resident)
        pl.BlockSpec((1, H1p), lambda i: (0, 0)),       # b1
        pl.BlockSpec((H1p, H2p), lambda i: (0, 0)),     # W2 (xs part)
        pl.BlockSpec((A, H2p), lambda i: (0, 0)),       # W2 (action part, f32)
        pl.BlockSpec((1, H2p), lambda i: (0, 0)),       # b2
        pl.BlockSpec((1, H2p), lambda i: (0, 0)),       # W3 as a row
    ]
    out_spec = pl.BlockSpec((tile_b, 1), lambda i: (i, 0))

    weight_bytes = sum(int(t.size) * int(t.dtype.itemsize)
                       for t in (w1, b1, w2s, w2a, b2, w3))
    in_bytes = B * (S * state.dtype.itemsize + A * action.dtype.itemsize)
    flops = 2 * B * (S * H1p + H1p * H2p + A * H2p + H2p)
    cost = pl.CostEstimate(flops=flops, transcendentals=0,
                           bytes_accessed=weight_bytes + in_bytes + B * 4)

    q = pl.pallas_call(
        kernel,
        out_shape=jax.ShapeDtypeStruct((B, 1), jnp.float32),
        grid_spec=pltpu.PrefetchScalarGridSpec(
            num_scalar_prefetch=0,
            grid=grid,
            in_specs=in_specs,
            out_specs=out_spec,
        ),
        compiler_params=pltpu.CompilerParams(
            dimension_semantics=("parallel",),
        ),
        cost_estimate=cost,
    )(state, action, w1, b1, w2s, w2a, b2, w3)

    # b3 is a single scalar: fold it here instead of a padded VMEM tile.
    return q + b3


def init_critic_params(key, state_size, action_size,
                       fcs1_units=400, fc2_units=300):
    """Init mirroring nn.Linear's default U(-1/sqrt(fan_in), 1/sqrt(fan_in)).

    Weights are stored transposed (in_features, out_features); fc2's weight is
    split into the xs-part and the action-part so the kernel never
    concatenates.
    """
    k1, k2, k3, k4, k5, k6 = jax.random.split(key, 6)

    def u(k, shape, fan_in):
        bound = 1.0 / jnp.sqrt(jnp.float32(fan_in))
        return jax.random.uniform(k, shape, jnp.float32, -bound, bound)

    w1 = u(k1, (state_size, fcs1_units), state_size)
    b1 = u(k2, (1, fcs1_units), state_size)

    fc2_in = fcs1_units + action_size
    w2 = u(k3, (fc2_in, fc2_units), fc2_in)
    w2s, w2a = w2[:fcs1_units], w2[fcs1_units:]
    b2 = u(k4, (1, fc2_units), fc2_in)

    w3 = u(k5, (fc2_units, 1), fc2_units)
    b3 = u(k6, (1, 1), fc2_units)
    return (w1, b1, w2s, w2a, b2, w3, b3)


def critic_reference(state, action, params):
    """Plain-JAX reference of the PyTorch forward pass (unpadded, f32)."""
    w1, b1, w2s, w2a, b2, w3, b3 = params
    xs = jax.nn.relu(state @ w1 + b1)
    x = jnp.concatenate([xs, action], axis=1)
    w2 = jnp.concatenate([w2s, w2a], axis=0)
    h = jax.nn.relu(x @ w2 + b2)
    return h @ w3 + b3


if __name__ == "__main__":
    batch = 64            # tmax * nparal
    state_size = 32
    action_size = 4
    fcs1_units = 400
    fc2_units = 300

    key = jax.random.PRNGKey(0)
    kp, ks, ka, ks2, ka2 = jax.random.split(key, 5)

    params = init_critic_params(kp, state_size, action_size,
                                fcs1_units=fcs1_units, fc2_units=fc2_units)
    state = jax.random.normal(ks, (batch, state_size), jnp.float32)
    action = jax.random.normal(ka, (batch, action_size), jnp.float32)
    q_ref = critic_reference(state, action, params)

    # Default path: bf16 MXU operands, f32 accumulate + f32 elementwise.
    p_bf16 = prepare_critic_params(params)
    q_bf = jax.block_until_ready(critic_forward(state, action, p_bf16))
    assert q_bf.shape == (batch, 1)
    assert jnp.allclose(q_bf, q_ref, atol=5e-2, rtol=5e-2), "bf16 mismatch vs reference"

    # Full-f32 path (e.g. for a precision-sensitive target network).
    p_f32 = prepare_critic_params(params, compute_dtype=jnp.float32)
    q32 = jax.block_until_ready(critic_forward(state, action, p_f32))
    assert q32.shape == (batch, 1)
    assert jnp.allclose(q32, q_ref, atol=1e-4, rtol=1e-4), "f32 mismatch vs reference"

    # Multi-tile grid with a non-divisible batch (edge block clipped, no
    # wrapper padding copies): B=300, 128-row tiles -> grid=(3,).
    batch2 = 300
    state2 = jax.random.normal(ks2, (batch2, state_size), jnp.float32)
    action2 = jax.random.normal(ka2, (batch2, action_size), jnp.float32)
    q2 = jax.block_until_ready(
        critic_forward(state2, action2, p_bf16, max_tile_b=128))
    q2_ref = critic_reference(state2, action2, params)
    assert q2.shape == (batch2, 1)
    assert jnp.allclose(q2, q2_ref, atol=5e-2, rtol=5e-2), "gridded mismatch vs reference"

    print("KERNEL_OK")
</pallas_src>

<mosaic_0001>
module attributes {stable_mosaic.version = 11 : i64} {
  func.func @_critic_kernel(%arg0: i32, %arg1: memref<64x32xf32, #tpu.memory_space<vmem>>, %arg2: memref<64x4xf32, #tpu.memory_space<vmem>>, %arg3: memref<32x512xbf16, #tpu.memory_space<vmem>>, %arg4: memref<1x512xf32, #tpu.memory_space<vmem>>, %arg5: memref<512x384xbf16, #tpu.memory_space<vmem>>, %arg6: memref<4x384xf32, #tpu.memory_space<vmem>>, %arg7: memref<1x384xf32, #tpu.memory_space<vmem>>, %arg8: memref<1x384xf32, #tpu.memory_space<vmem>>, %arg9: memref<64x1xf32, #tpu.memory_space<vmem>>) attributes {dimension_semantics = [#tpu.dimension_semantics<parallel>], iteration_bounds = array<i64: 1>, scalar_prefetch = 0 : i64, scratch_operands = 0 : i64, tpu.core_type = #tpu.core_type<tc>, window_params = [{transform_indices = @transform_0, window_bounds = array<i64: 64, 32>}, {transform_indices = @transform_1, window_bounds = array<i64: 64, 4>}, {pipeline_mode = #tpu.pipeline_mode<synchronous>, transform_indices = @transform_2, window_bounds = array<i64: 32, 512>}, {pipeline_mode = #tpu.pipeline_mode<synchronous>, transform_indices = @transform_3, window_bounds = array<i64: 1, 512>}, {pipeline_mode = #tpu.pipeline_mode<synchronous>, transform_indices = @transform_4, window_bounds = array<i64: 512, 384>}, {pipeline_mode = #tpu.pipeline_mode<synchronous>, transform_indices = @transform_5, window_bounds = array<i64: 4, 384>}, {pipeline_mode = #tpu.pipeline_mode<synchronous>, transform_indices = @transform_6, window_bounds = array<i64: 1, 384>}, {pipeline_mode = #tpu.pipeline_mode<synchronous>, transform_indices = @transform_7, window_bounds = array<i64: 1, 384>}, {transform_indices = @transform_8, window_bounds = array<i64: 64, 1>}]} {
    %c0 = arith.constant 0 : index
    %c0_0 = arith.constant 0 : index
    %0 = vector.load %arg1[%c0, %c0_0] : memref<64x32xf32, #tpu.memory_space<vmem>>, vector<64x32xf32>
    %1 = arith.truncf %0 : vector<64x32xf32> to vector<64x32xbf16>
    %c0_1 = arith.constant 0 : index
    %c0_2 = arith.constant 0 : index
    %2 = vector.load %arg3[%c0_1, %c0_2] : memref<32x512xbf16, #tpu.memory_space<vmem>>, vector<32x512xbf16>
    %cst = arith.constant dense<0.000000e+00> : vector<64x512xf32>
    %3 = tpu.matmul %1, %2, %cst {dimension_numbers = #tpu.dot_dimension_numbers<[1], [0], [0], [1], [0, 0, 1, 1], [], []>} : vector<64x32xbf16>, vector<32x512xbf16>, vector<64x512xf32> -> vector<64x512xf32>
    %c0_3 = arith.constant 0 : index
    %c0_4 = arith.constant 0 : index
    %4 = vector.load %arg4[%c0_3, %c0_4] : memref<1x512xf32, #tpu.memory_space<vmem>>, vector<1x512xf32>
    %5 = vector.broadcast %4 : vector<1x512xf32> to vector<64x512xf32>
    %6 = arith.addf %3, %5 : vector<64x512xf32>
    %cst_5 = arith.constant 0.000000e+00 : f32
    %7 = vector.broadcast %cst_5 : f32 to vector<64x512xf32>
    %8 = arith.maximumf %6, %7 : vector<64x512xf32>
    %9 = arith.truncf %8 : vector<64x512xf32> to vector<64x512xbf16>
    %c0_6 = arith.constant 0 : index
    %c0_7 = arith.constant 0 : index
    %10 = vector.load %arg5[%c0_6, %c0_7] : memref<512x384xbf16, #tpu.memory_space<vmem>>, vector<512x384xbf16>
    %cst_8 = arith.constant dense<0.000000e+00> : vector<64x384xf32>
    %11 = tpu.matmul %9, %10, %cst_8 {dimension_numbers = #tpu.dot_dimension_numbers<[1], [0], [0], [1], [0, 0, 1, 1], [], []>} : vector<64x512xbf16>, vector<512x384xbf16>, vector<64x384xf32> -> vector<64x384xf32>
    %c0_9 = arith.constant 0 : index
    %c0_10 = arith.constant 0 : index
    %12 = vector.load %arg2[%c0_9, %c0_10] : memref<64x4xf32, #tpu.memory_space<vmem>>, vector<64x4xf32>
    %c0_11 = arith.constant 0 : index
    %c0_12 = arith.constant 0 : index
    %13 = vector.load %arg6[%c0_11, %c0_12] : memref<4x384xf32, #tpu.memory_space<vmem>>, vector<4x384xf32>
    %14 = vector.extract_strided_slice %12 {offsets = [0, 0], sizes = [64, 1], strides = [1, 1]} : vector<64x4xf32> to vector<64x1xf32>
    %15 = vector.extract_strided_slice %13 {offsets = [0, 0], sizes = [1, 384], strides = [1, 1]} : vector<4x384xf32> to vector<1x384xf32>
    %16 = vector.broadcast %14 : vector<64x1xf32> to vector<64x384xf32>
    %17 = vector.broadcast %15 : vector<1x384xf32> to vector<64x384xf32>
    %18 = arith.mulf %16, %17 : vector<64x384xf32>
    %19 = arith.addf %11, %18 : vector<64x384xf32>
    %20 = vector.extract_strided_slice %12 {offsets = [0, 1], sizes = [64, 1], strides = [1, 1]} : vector<64x4xf32> to vector<64x1xf32>
    %21 = vector.extract_strided_slice %13 {offsets = [1, 0], sizes = [1, 384], strides = [1, 1]} : vector<4x384xf32> to vector<1x384xf32>
    %22 = vector.broadcast %20 : vector<64x1xf32> to vector<64x384xf32>
    %23 = vector.broadcast %21 : vector<1x384xf32> to vector<64x384xf32>
    %24 = arith.mulf %22, %23 : vector<64x384xf32>
    %25 = arith.addf %19, %24 : vector<64x384xf32>
    %26 = vector.extract_strided_slice %12 {offsets = [0, 2], sizes = [64, 1], strides = [1, 1]} : vector<64x4xf32> to vector<64x1xf32>
    %27 = vector.extract_strided_slice %13 {offsets = [2, 0], sizes = [1, 384], strides = [1, 1]} : vector<4x384xf32> to vector<1x384xf32>
    %28 = vector.broadcast %26 : vector<64x1xf32> to vector<64x384xf32>
    %29 = vector.broadcast %27 : vector<1x384xf32> to vector<64x384xf32>
    %30 = arith.mulf %28, %29 : vector<64x384xf32>
    %31 = arith.addf %25, %30 : vector<64x384xf32>
    %32 = vector.extract_strided_slice %12 {offsets = [0, 3], sizes = [64, 1], strides = [1, 1]} : vector<64x4xf32> to vector<64x1xf32>
    %33 = vector.extract_strided_slice %13 {offsets = [3, 0], sizes = [1, 384], strides = [1, 1]} : vector<4x384xf32> to vector<1x384xf32>
    %34 = vector.broadcast %32 : vector<64x1xf32> to vector<64x384xf32>
    %35 = vector.broadcast %33 : vector<1x384xf32> to vector<64x384xf32>
    %36 = arith.mulf %34, %35 : vector<64x384xf32>
    %37 = arith.addf %31, %36 : vector<64x384xf32>
    %c0_13 = arith.constant 0 : index
    %c0_14 = arith.constant 0 : index
    %38 = vector.load %arg7[%c0_13, %c0_14] : memref<1x384xf32, #tpu.memory_space<vmem>>, vector<1x384xf32>
    %39 = vector.broadcast %38 : vector<1x384xf32> to vector<64x384xf32>
    %40 = arith.addf %37, %39 : vector<64x384xf32>
    %cst_15 = arith.constant 0.000000e+00 : f32
    %41 = vector.broadcast %cst_15 : f32 to vector<64x384xf32>
    %42 = arith.maximumf %40, %41 : vector<64x384xf32>
    %c0_16 = arith.constant 0 : index
    %c0_17 = arith.constant 0 : index
    %43 = vector.load %arg8[%c0_16, %c0_17] : memref<1x384xf32, #tpu.memory_space<vmem>>, vector<1x384xf32>
    %44 = vector.broadcast %43 : vector<1x384xf32> to vector<64x384xf32>
    %45 = arith.mulf %42, %44 : vector<64x384xf32>
    %cst_18 = arith.constant dense<0.000000e+00> : vector<64xf32>
    %46 = vector.multi_reduction <add>, %45, %cst_18 [1] : vector<64x384xf32> to vector<64xf32>
    %47 = vector.shape_cast %46 : vector<64xf32> to vector<64x1xf32>
    %c0_19 = arith.constant 0 : index
    %c0_20 = arith.constant 0 : index
    %48 = vector.load %arg9[%c0_19, %c0_20] : memref<64x1xf32, #tpu.memory_space<vmem>>, vector<64x1xf32>
    tpu.vector_store %arg9[%c0_19, %c0_20], %47 {strides = array<i32>} : memref<64x1xf32, #tpu.memory_space<vmem>>, vector<64x1xf32>,
    return
  }
  func.func @transform_0(%arg0: i32) -> (i32, i32) {
    %c0_i32 = arith.constant 0 : i32
    %c0_i32_0 = arith.constant 0 : i32
    return %arg0, %c0_i32 : i32, i32
  }
  func.func @transform_1(%arg0: i32) -> (i32, i32) {
    %c0_i32 = arith.constant 0 : i32
    %c0_i32_0 = arith.constant 0 : i32
    return %arg0, %c0_i32 : i32, i32
  }
  func.func @transform_2(%arg0: i32) -> (i32, i32) {
    %c0_i32 = arith.constant 0 : i32
    %c0_i32_0 = arith.constant 0 : i32
    %c0_i32_1 = arith.constant 0 : i32
    return %c0_i32, %c0_i32_0 : i32, i32
  }
  func.func @transform_3(%arg0: i32) -> (i32, i32) {
    %c0_i32 = arith.constant 0 : i32
    %c0_i32_0 = arith.constant 0 : i32
    %c0_i32_1 = arith.constant 0 : i32
    return %c0_i32, %c0_i32_0 : i32, i32
  }
  func.func @transform_4(%arg0: i32) -> (i32, i32) {
    %c0_i32 = arith.constant 0 : i32
    %c0_i32_0 = arith.constant 0 : i32
    %c0_i32_1 = arith.constant 0 : i32
    return %c0_i32, %c0_i32_0 : i32, i32
  }
  func.func @transform_5(%arg0: i32) -> (i32, i32) {
    %c0_i32 = arith.constant 0 : i32
    %c0_i32_0 = arith.constant 0 : i32
    %c0_i32_1 = arith.constant 0 : i32
    return %c0_i32, %c0_i32_0 : i32, i32
  }
  func.func @transform_6(%arg0: i32) -> (i32, i32) {
    %c0_i32 = arith.constant 0 : i32
    %c0_i32_0 = arith.constant 0 : i32
    %c0_i32_1 = arith.constant 0 : i32
    return %c0_i32, %c0_i32_0 : i32, i32
  }
  func.func @transform_7(%arg0: i32) -> (i32, i32) {
    %c0_i32 = arith.constant 0 : i32
    %c0_i32_0 = arith.constant 0 : i32
    %c0_i32_1 = arith.constant 0 : i32
    return %c0_i32, %c0_i32_0 : i32, i32
  }
  func.func @transform_8(%arg0: i32) -> (i32, i32) {
    %c0_i32 = arith.constant 0 : i32
    %c0_i32_0 = arith.constant 0 : i32
    return %arg0, %c0_i32 : i32, i32
  }
}

</mosaic_0001>

<bundles_post_ra>
// kernel: tpu_custom_call.1
= control target key start
LH: loop header
LB: loop body
LE: loop exit
PB: predicated region body
PF: predicated region fallthrough
CT: control target
= control target key end

     0   :  { %13 = vsyncpa [#allocation3], 0  ;;  %s2194_s27 = smov [#allocation2]   ;;  %s3022_s0 = inlined_call_operand.vmem [shape: f32[64,32], index: 0, kind: input, shape index: {}]   ;;  %s3023_s1 = inlined_call_operand.vmem [shape: f32[64,4], index: 1, kind: input, shape index: {}]   ;;  %s3024_s2 = inlined_call_operand.vmem [shape: bf16[32,512], index: 2, kind: input, shape index: {}]   ;;  %s3025_s3 = inlined_call_operand.vmem [shape: f32[1,512], index: 3, kind: input, shape index: {}]   ;;  %s3026_s4 = inlined_call_operand.hbm [shape: bf16[512,384], index: 4, kind: input, shape index: {}]   ;;  %s3027_s5 = inlined_call_operand.vmem [shape: f32[4,384], index: 5, kind: input, shape index: {}]   ;;  %s3028_s6 = inlined_call_operand.vmem [shape: f32[1,384], index: 6, kind: input, shape index: {}]   ;;  %s3029_s7 = inlined_call_operand.vmem [shape: f32[1,384], index: 7, kind: input, shape index: {}]   ;;  %s3030_s8 = inlined_call_operand.vmem [shape: f32[64,1], index: 8, kind: output, shape index: {}]  }
   0x1   :  { %s27_s28 = sshll.u32 %s2194_s27, 4  ;;  %s28_s28 = int_to_ptr.vmem [resolvable:$true] %s27_s28 }
   0x2   :  { %s2180_s29 = scalar_lea.vmem %s28_s28, 12288  ;;  %p2185_p1 = scmp.lt.s32.totalorder %s28_s28, %s28_s28 }
   0x3   :  { %p2181_p0 = scmp.ne.s32.totalorder %s28_s28, %s2180_s29  ;;  %p2186_p2 = scmp.lt.s32.totalorder %s2180_s29, %s2180_s29 }
   0x5   :  { %p2187_p3 = por %p2186_p2, %p2185_p1 }
   0x7   :  { %p2188_p4 = pnand %p2187_p3, %p2181_p0 }
   0x9   :  { %2191 = shalt.err (!%p2188_p4)
}
   0xa   :  { %s2195_s30 = smov 192   ;;  %s2196_s9 = smov 12  }
   0xb   :  { %33 = dma.hbm_to_vmem [thread:$0]  %s3026_s4, 12288, %s28_s28, [#allocation3], %s2195_s30, %s2195_s30, %s2196_s9  }
   0xc   :  { %2192 = dma.done.wait [#allocation3], 12288  }
   0xd   :  { %2193 = vsyncadd [#allocation3], 4294955008  ;;  %v2197_v0 = vmov 0   ;;  %v2032_v1 = vld [vmem:[%s3024_s2 + $0x24] ss:$16 sps:$4 sm:$0xff]   ;;  %v45_v10 = vld [vmem:[%s3022_s0 + $0x8] sm:$0xff] }
   0xe   :  { %171 = vmatprep.mubr.bf16.mxu0 %v2197_v0  ;;  %244 = vmatprep.mubr.bf16.mxu1 %v2197_v0  ;;  %v2034_v2 = vld [vmem:[%s3024_s2 + $0x2c] ss:$16 sps:$4 sm:$0xff]   ;;  %v2036_v3 = vld [vmem:[%s3024_s2 + $0x20] ss:$16 sps:$4 sm:$0xff]   ;;  %v2037_v4 = vld [vmem:[%s3024_s2 + $0x28] ss:$16 sps:$4 sm:$0xff]  }
   0xf   :  { %2025 = vset.pattern.permute.xlu1 %v2197_v0  ;;  %2024 = vset.pattern.permute.xlu0 %v2197_v0  ;;  %v2038_v5 = vld [vmem:[%s3024_s2 + $0x4] ss:$16 sps:$4 sm:$0xff]   ;;  %v2040_v6 = vld [vmem:[%s3024_s2 + $0xc] ss:$16 sps:$4 sm:$0xff]   ;;  %v2042_v7 = vld [vmem:[%s3024_s2] ss:$16 sps:$4 sm:$0xff]  }
  0x10   :  { %151 = vmatprep.subr.bf16.mxu0 %v2032_v1  ;;  %224 = vmatprep.subr.bf16.mxu1 %v2034_v2  ;;  %v2043_v8 = vld [vmem:[%s3024_s2 + $0x8] ss:$16 sps:$4 sm:$0xff]   ;;  %v44_v9 = vld [vmem:[%s3022_s0] sm:$0xff]  ;;  %vm126_vm0 = vcmask 261120   ;;  %v46_v16 = vld [vmem:[%s3022_s0 + $0x10] sm:$0xff]  ;;  %vm1811_vm1 = vcmask 7168  }
  0x11   :  { %152 = vmatpush1.bf16.msra.mxu0 %v2036_v3  ;;  %225 = vmatpush1.bf16.msra.mxu1 %v2037_v4  ;;  %v52_v11 = vpack.c.bf16 %v45_v10, %v44_v9  ;;  %v2044_v12 = vld [vmem:[#allocation2 + $0xa8] ss:$12 sps:$4 sm:$0xff]   ;;  %v2046_v13 = vld [vmem:[#allocation2 + $0xac] ss:$12 sps:$4 sm:$0xff]   ;;  %v2050_v20 = vld [vmem:[#allocation2 + $0x90] ss:$12 sps:$4 sm:$0xff]  }
  0x12   :  { %153 = vmatprep.subr.bf16.mxu0 %v2038_v5  ;;  %226 = vmatprep.subr.bf16.mxu1 %v2040_v6  ;;  %v2047_v14 = vld [vmem:[#allocation2 + $0x228] ss:$12 sps:$4 sm:$0xff]   ;;  %v2049_v15 = vld [vmem:[#allocation2 + $0x22c] ss:$12 sps:$4 sm:$0xff]   ;;  %v2053_v21 = vld [vmem:[#allocation2 + $0x210] ss:$12 sps:$4 sm:$0xff]  }
  0x13   :  { %v2052_v17 = vld [vmem:[#allocation2 + $0x94] ss:$12 sps:$4 sm:$0xff]   ;;  %v47_v18 = vld [vmem:[%s3022_s0 + $0x18] sm:$0xff]  ;;  %v2064_v28 = vld [vmem:[#allocation2 + $0x64] ss:$12 sps:$4 sm:$0xff]  }
  0x14   :  { %v2055_v19 = vld [vmem:[#allocation2 + $0x214] ss:$12 sps:$4 sm:$0xff]   ;;  %v53_v22 = vpack.c.bf16 %v47_v18, %v46_v16  ;;  %v2058_v23 = vld [vmem:[#allocation2 + $0x7c] ss:$12 sps:$4 sm:$0xff]   ;;  %v2056_v26 = vld [vmem:[#allocation2 + $0x78] ss:$12 sps:$4 sm:$0xff]  }
  0x15   :  { %154 = vmatpush1.bf16.msra.mxu0 %v2042_v7  ;;  %227 = vmatpush1.bf16.msra.mxu1 %v2043_v8  ;;  %v2061_v24 = vld [vmem:[#allocation2 + $0x1fc] ss:$12 sps:$4 sm:$0xff]   ;;  %v48_v25 = vld [vmem:[%s3022_s0 + $0x20] sm:$0xff]  ;;  %v2070_v34 = vld [vmem:[#allocation2 + $0x4c] ss:$12 sps:$4 sm:$0xff]  }
  0x16   :  { %1076 = vmatprep.subr.bf16.mxu0 %v2046_v13  ;;  %1149 = vmatprep.subr.bf16.mxu1 %v2049_v15  ;;  %v2059_v27 = vld [vmem:[#allocation2 + $0x1f8] ss:$12 sps:$4 sm:$0xff]   ;;  %v49_v30 = vld [vmem:[%s3022_s0 + $0x28] sm:$0xff]  ;;  %v50_v36 = vld [vmem:[%s3022_s0 + $0x30] sm:$0xff] }
  0x17   :  { %v2067_v29 = vld [vmem:[#allocation2 + $0x1e4] ss:$12 sps:$4 sm:$0xff]   ;;  %v2062_v31 = vld [vmem:[#allocation2 + $0x60] ss:$12 sps:$4 sm:$0xff]   ;;  %v54_v33 = vpack.c.bf16 %v49_v30, %v48_v25  ;;  %v2068_v37 = vld [vmem:[#allocation2 + $0x48] ss:$12 sps:$4 sm:$0xff]  }
  0x18   :  { %1833 = vmatmul.mubr.msk.bf16.vlgmr.msra.gmra.mxu0 %vm126_vm0, %v52_v11  ;;  %1837 = vmatmul.mubr.msk.bf16.vlgmr.msra.gmra.mxu1 %vm126_vm0, %v52_v11  ;;  %v2065_v32 = vld [vmem:[#allocation2 + $0x1e0] ss:$12 sps:$4 sm:$0xff]   ;;  %v2071_v38 = vld [vmem:[#allocation2 + $0x1c8] ss:$12 sps:$4 sm:$0xff]   ;;  %v51_v41 = vld [vmem:[%s3022_s0 + $0x38] sm:$0xff] }
  0x19   :  { %181 = vmatprep.mubr.bf16.mxu0 %v2197_v0  ;;  %254 = vmatprep.mubr.bf16.mxu1 %v2197_v0  ;;  %v2073_v35 = vld [vmem:[#allocation2 + $0x1cc] ss:$12 sps:$4 sm:$0xff]   ;;  %v2076_v39 = vld [vmem:[#allocation2 + $0x34] ss:$12 sps:$4 sm:$0xff]   ;;  %v2074_v42 = vld [vmem:[#allocation2 + $0x30] ss:$12 sps:$4 sm:$0xff]   ;;  %v55_v44 = vpack.c.bf16 %v51_v41, %v50_v36 }
  0x1a   :  { %1077 = vmatpush1.bf16.msra.mxu0 %v2044_v12  ;;  %1150 = vmatpush1.bf16.msra.mxu1 %v2047_v14  ;;  %v2079_v40 = vld [vmem:[#allocation2 + $0x1b4] ss:$12 sps:$4 sm:$0xff]   ;;  %v2077_v43 = vld [vmem:[#allocation2 + $0x1b0] ss:$12 sps:$4 sm:$0xff]   ;;  %v2080_v47 = vld [vmem:[#allocation2 + $0x18] ss:$12 sps:$4 sm:$0xff]  }
  0x1b   :  { %1078 = vmatprep.subr.bf16.mxu0 %v2052_v17  ;;  %1151 = vmatprep.subr.bf16.mxu1 %v2055_v19  ;;  %v2082_v45 = vld [vmem:[#allocation2 + $0x1c] ss:$12 sps:$4 sm:$0xff]   ;;  %v2083_v48 = vld [vmem:[#allocation2 + $0x198] ss:$12 sps:$4 sm:$0xff]   ;;  %v2086_v51 = vld [vmem:[#allocation2] ss:$12 sps:$4 sm:$0xff]  }
  0x1c   :  { %v2085_v46 = vld [vmem:[#allocation2 + $0x19c] ss:$12 sps:$4 sm:$0xff]   ;;  %v2088_v49 = vld [vmem:[#allocation2 + $0x4] ss:$12 sps:$4 sm:$0xff]   ;;  %v2089_v52 = vld [vmem:[#allocation2 + $0x180] ss:$12 sps:$4 sm:$0xff]  }
  0x1d   :  { %v2091_v50 = vld [vmem:[#allocation2 + $0x184] ss:$12 sps:$4 sm:$0xff]   ;;  %v2094_v53 = vld [vmem:[#allocation2 + $0x16c] ss:$12 sps:$4 sm:$0xff]   ;;  %v2092_v55 = vld [vmem:[#allocation2 + $0x168] ss:$12 sps:$4 sm:$0xff]  }
  0x1e   :  { %1079 = vmatpush1.bf16.msra.mxu0 %v2050_v20  ;;  %1152 = vmatpush1.bf16.msra.mxu1 %v2053_v21  ;;  %v2097_v54 = vld [vmem:[#allocation2 + $0x2ec] ss:$12 sps:$4 sm:$0xff]   ;;  %v2095_v56 = vld [vmem:[#allocation2 + $0x2e8] ss:$12 sps:$4 sm:$0xff]   ;;  %v2098_v59 = vld [vmem:[#allocation2 + $0x150] ss:$12 sps:$4 sm:$0xff]  }
  0x1f   :  { %1080 = vmatprep.subr.bf16.mxu0 %v2058_v23  ;;  %1153 = vmatprep.subr.bf16.mxu1 %v2061_v24  ;;  %v2100_v57 = vld [vmem:[#allocation2 + $0x154] ss:$12 sps:$4 sm:$0xff]   ;;  %v2101_v60 = vld [vmem:[#allocation2 + $0x2d0] ss:$12 sps:$4 sm:$0xff]   ;;  %v2104_v63 = vld [vmem:[#allocation2 + $0x138] ss:$12 sps:$4 sm:$0xff]  }
  0x20   :  { %1834 = vmatmul.mubr.msk.bf16.gmra.mxu0 %vm126_vm0, %v53_v22  ;;  %1838 = vmatmul.mubr.msk.bf16.gmra.mxu1 %vm126_vm0, %v53_v22  ;;  %v2103_v58 = vld [vmem:[#allocation2 + $0x2d4] ss:$12 sps:$4 sm:$0xff]   ;;  %v2106_v61 = vld [vmem:[#allocation2 + $0x13c] ss:$12 sps:$4 sm:$0xff]   ;;  %v2112_v1 = vld [vmem:[#allocation2 + $0x124] ss:$12 sps:$4 sm:$0xff]  }
  0x21   :  { %191 = vmatprep.mubr.bf16.mxu0 %v2197_v0  ;;  %264 = vmatprep.mubr.bf16.mxu1 %v2197_v0  ;;  %v2109_v62 = vld [vmem:[#allocation2 + $0x2bc] ss:$12 sps:$4 sm:$0xff]   ;;  %v2115_v2 = vld [vmem:[#allocation2 + $0x2a4] ss:$12 sps:$4 sm:$0xff]   ;;  %v2110_v3 = vld [vmem:[#allocation2 + $0x120] ss:$12 sps:$4 sm:$0xff]  }
  0x22   :  { %1081 = vmatpush1.bf16.msra.mxu0 %v2056_v26  ;;  %1154 = vmatpush1.bf16.msra.mxu1 %v2059_v27  ;;  %v2113_v4 = vld [vmem:[#allocation2 + $0x2a0] ss:$12 sps:$4 sm:$0xff]   ;;  %v2116_v7 = vld [vmem:[#allocation2 + $0x108] ss:$12 sps:$4 sm:$0xff]   ;;  %v2122_v11 = vld [vmem:[#allocation2 + $0xf0] ss:$12 sps:$4 sm:$0xff]  }
  0x23   :  { %1082 = vmatprep.subr.bf16.mxu0 %v2064_v28  ;;  %1155 = vmatprep.subr.bf16.mxu1 %v2067_v29  ;;  %v2118_v5 = vld [vmem:[#allocation2 + $0x10c] ss:$12 sps:$4 sm:$0xff]   ;;  %v2119_v8 = vld [vmem:[#allocation2 + $0x288] ss:$12 sps:$4 sm:$0xff]   ;;  %v2125_v12 = vld [vmem:[#allocation2 + $0x270] ss:$12 sps:$4 sm:$0xff]  }
  0x24   :  { %v2121_v6 = vld [vmem:[#allocation2 + $0x28c] ss:$12 sps:$4 sm:$0xff]   ;;  %v2124_v9 = vld [vmem:[#allocation2 + $0xf4] ss:$12 sps:$4 sm:$0xff]   ;;  %v2130_v13 = vld [vmem:[#allocation2 + $0xdc] ss:$12 sps:$4 sm:$0xff]  }
  0x25   :  { %v2127_v10 = vld [vmem:[#allocation2 + $0x274] ss:$12 sps:$4 sm:$0xff]   ;;  %v2133_v14 = vld [vmem:[#allocation2 + $0x25c] ss:$12 sps:$4 sm:$0xff]   ;;  %v2128_v15 = vld [vmem:[#allocation2 + $0xd8] ss:$12 sps:$4 sm:$0xff]  }
  0x26   :  { %1083 = vmatpush1.bf16.msra.mxu0 %v2062_v31  ;;  %1156 = vmatpush1.bf16.msra.mxu1 %v2065_v32  ;;  %v2131_v16 = vld [vmem:[#allocation2 + $0x258] ss:$12 sps:$4 sm:$0xff]   ;;  %v2134_v19 = vld [vmem:[#allocation2 + $0xc0] ss:$12 sps:$4 sm:$0xff]   ;;  %v2140_v21 = vld [vmem:[#allocation2 + $0x170] ss:$12 sps:$4 sm:$0xff]  }
  0x27   :  { %1084 = vmatprep.subr.bf16.mxu0 %v2070_v34  ;;  %1157 = vmatprep.subr.bf16.mxu1 %v2073_v35  ;;  %v2136_v17 = vld [vmem:[#allocation2 + $0xc4] ss:$12 sps:$4 sm:$0xff]   ;;  %v2137_v20 = vld [vmem:[#allocation2 + $0x240] ss:$12 sps:$4 sm:$0xff]   ;;  %v464_v24 = vld [vmem:[%s3023_s1 + $0x18] sm:$0xff]  ;;  %v2198_v31 = vmov 1   ;;  %v66_v34 = vlaneseq }
  0x28   :  { %1835 = vmatmul.mubr.msk.bf16.gmra.mxu0 %vm126_vm0, %v54_v33  ;;  %1839 = vmatmul.mubr.msk.bf16.gmra.mxu1 %vm126_vm0, %v54_v33  ;;  %v2139_v18 = vld [vmem:[#allocation2 + $0x244] ss:$12 sps:$4 sm:$0xff]   ;;  %v466_v26 = vld [vmem:[%s3023_s1 + $0x28] sm:$0xff]  ;;  %v468_v28 = vld [vmem:[%s3023_s1 + $0x38] sm:$0xff]  ;;  %v2199_v32 = vmov 2   ;;  %v2200_v33 = vmov 3  }
  0x29   :  { %201 = vmatprep.mubr.bf16.mxu0 %v2197_v0  ;;  %274 = vmatprep.mubr.bf16.mxu1 %v2197_v0  ;;  %v2107_v0 = vld [vmem:[#allocation2 + $0x2b8] ss:$12 sps:$4 sm:$0xff]   ;;  %v2142_v22 = vld [vmem:[#allocation2 + $0x2f0] ss:$12 sps:$4 sm:$0xff]   ;;  %v462_v27 = vld [vmem:[%s3023_s1 + $0x8] sm:$0xff]  ;;  %v2339_v35 = vshrl.u32 %v66_v34, 7 }
  0x2a   :  { %1085 = vmatpush1.bf16.msra.mxu0 %v2068_v37  ;;  %1158 = vmatpush1.bf16.msra.mxu1 %v2071_v38  ;;  %v463_v23 = vld [vmem:[%s3023_s1 + $0x10] sm:$0xff]  ;;  %v461_v25 = vld [vmem:[%s3023_s1] sm:$0xff] }
  0x2b   :  { %1086 = vmatprep.subr.bf16.mxu0 %v2076_v39  ;;  %1159 = vmatprep.subr.bf16.mxu1 %v2079_v40  ;;  %v465_v29 = vld [vmem:[%s3023_s1 + $0x20] sm:$0xff]  ;;  %v467_v30 = vld [vmem:[%s3023_s1 + $0x30] sm:$0xff]  ;;  %v2342_v36 = vsub.s32 1, %v2339_v35  ;;  %v2345_v37 = vsub.s32 3, %v2339_v35  ;;  %v2348_v38 = vsub.s32 0, %v2339_v35  ;;  %v2351_v39 = vsub.s32 2, %v2339_v35 }
  0x2c   :  { %483 = vperm.xlu1 %2025, %v463_v23   ;;  %473 = vperm.xlu0 %2024, %v461_v25   ;;  %v64_v40 = vld [vmem:[%s3025_s3] sm:$0xf]  ;;  %v2147_v34 = vld [vmem:[#allocation2 + $0x218] ss:$12 sps:$4 sm:$0xff]  }
  0x2e   :  { %1087 = vmatpush1.bf16.msra.mxu0 %v2074_v42  ;;  %1160 = vmatpush1.bf16.msra.mxu1 %v2077_v43  ;;  %v2357_v43 = vrot.slane %v64_v40, %v2342_v36 }
  0x2f   :  { %1088 = vmatprep.subr.bf16.mxu0 %v2082_v45  ;;  %1161 = vmatprep.subr.bf16.mxu1 %v2085_v46  ;;  %v2363_v45 = vrot.slane %v64_v40, %v2348_v38  ;;  %v2366_v46 = vrot.slane %v64_v40, %v2351_v39 }
  0x30   :  { %1836 = vmatmul.mubr.msk.bf16.gmra.mxu0 %vm126_vm0, %v55_v44  ;;  %1840 = vmatmul.mubr.msk.bf16.gmra.mxu1 %vm126_vm0, %v55_v44  ;;  %v2360_v44 = vrot.slane %v64_v40, %v2345_v37  ;;  %v2148_v40 = vld [vmem:[#allocation2 + $0x140] ss:$12 sps:$4 sm:$0xff]  }
  0x31   :  { %488 = vperm.xlu1 %2025, %v464_v24   ;;  %478 = vperm.xlu0 %2024, %v462_v27  }
  0x32   :  { %1089 = vmatpush1.bf16.msra.mxu0 %v2080_v47  ;;  %1162 = vmatpush1.bf16.msra.mxu1 %v2083_v48 }
  0x33   :  { %1090 = vmatprep.subr.bf16.mxu0 %v2088_v49  ;;  %1163 = vmatprep.subr.bf16.mxu1 %v2091_v50 }
  0x35   :  { %498 = vperm.xlu1 %2025, %v466_v26   ;;  %493 = vperm.xlu0 %2024, %v465_v29  }
  0x36   :  { %1091 = vmatpush1.bf16.msra.mxu0 %v2086_v51  ;;  %1164 = vmatpush1.bf16.msra.mxu1 %v2089_v52 }
  0x37   :  { %1092 = vmatprep.subr.bf16.mxu0 %v2094_v53  ;;  %1165 = vmatprep.subr.bf16.mxu1 %v2097_v54 }
  0x39   :  { %508 = vperm.xlu1 %2025, %v468_v28   ;;  %503 = vperm.xlu0 %2024, %v467_v30  }
  0x3a   :  { %1093 = vmatpush2.bf16.msra.mxu0 %v2092_v55  ;;  %1166 = vmatpush2.bf16.msra.mxu1 %v2095_v56 }
  0x3b   :  { %1094 = vmatprep.subr.bf16.mxu0 %v2100_v57  ;;  %1167 = vmatprep.subr.bf16.mxu1 %v2103_v58 }
  0x3d   :  { %2027 = vset.pattern.permute.xlu1 %v2198_v31  ;;  %2026 = vset.pattern.permute.xlu0 %v2198_v31 }
  0x3e   :  { %1095 = vmatpush2.bf16.msra.mxu0 %v2098_v59  ;;  %1168 = vmatpush2.bf16.msra.mxu1 %v2101_v60 }
  0x3f   :  { %1096 = vmatprep.subr.bf16.mxu0 %v2106_v61  ;;  %1169 = vmatprep.subr.bf16.mxu1 %v2109_v62 }
  0x40   :  { %1357 = vperm.xlu1 %2027, %v462_v27   ;;  %1353 = vperm.xlu0 %2026, %v461_v25  }
  0x42   :  { %1097 = vmatpush2.bf16.msra.mxu0 %v2104_v63  ;;  %1170 = vmatpush2.bf16.msra.mxu1 %v2107_v0 }
  0x43   :  { %1098 = vmatprep.subr.bf16.mxu0 %v2112_v1  ;;  %1171 = vmatprep.subr.bf16.mxu1 %v2115_v2 }
  0x44   :  { %1361 = vperm.xlu1 %2027, %v463_v23   ;;  %1365 = vperm.xlu0 %2026, %v464_v24  }
  0x46   :  { %1099 = vmatpush2.bf16.msra.mxu0 %v2110_v3  ;;  %1172 = vmatpush2.bf16.msra.mxu1 %v2113_v4 }
  0x47   :  { %1100 = vmatprep.subr.bf16.mxu0 %v2118_v5  ;;  %1173 = vmatprep.subr.bf16.mxu1 %v2121_v6 }
  0x48   :  { %1369 = vperm.xlu1 %2027, %v465_v29   ;;  %1373 = vperm.xlu0 %2026, %v466_v26  }
  0x4a   :  { %1101 = vmatpush2.bf16.msra.mxu0 %v2116_v7  ;;  %1174 = vmatpush2.bf16.msra.mxu1 %v2119_v8 }
  0x4b   :  { %1102 = vmatprep.subr.bf16.mxu0 %v2124_v9  ;;  %1175 = vmatprep.subr.bf16.mxu1 %v2127_v10 }
  0x4c   :  { %1377 = vperm.xlu1 %2027, %v467_v30   ;;  %1381 = vperm.xlu0 %2026, %v468_v28  }
  0x4e   :  { %1103 = vmatpush2.bf16.msra.mxu0 %v2122_v11  ;;  %1176 = vmatpush2.bf16.msra.mxu1 %v2125_v12  ;;  %v2141_v11 = vld [vmem:[#allocation2 + $0xb0] ss:$12 sps:$4 sm:$0xff]  }
  0x4f   :  { %1104 = vmatprep.subr.bf16.mxu0 %v2130_v13  ;;  %1177 = vmatprep.subr.bf16.mxu1 %v2133_v14  ;;  %v2143_v12 = vld [vmem:[#allocation2 + $0x230] ss:$12 sps:$4 sm:$0xff]  }
  0x50   :  { %2028 = vset.pattern.permute.xlu1 %v2199_v32  ;;  %2029 = vset.pattern.permute.xlu0 %v2199_v32 }
  0x51   :  { %1460 = vperm.xlu1 %2028, %v461_v25   ;;  %1464 = vperm.xlu0 %2029, %v462_v27  }
  0x52   :  { %1105 = vmatpush2.bf16.msra.mxu0 %v2128_v15  ;;  %1178 = vmatpush2.bf16.msra.mxu1 %v2131_v16 }
  0x53   :  { %1106 = vmatprep.subr.bf16.mxu0 %v2136_v17  ;;  %1179 = vmatprep.subr.bf16.mxu1 %v2139_v18  ;;  %v2144_v18 = vld [vmem:[#allocation2 + $0x158] ss:$12 sps:$4 sm:$0xff]  }
  0x55   :  { %1468 = vperm.xlu1 %2028, %v463_v23   ;;  %1476 = vperm.xlu0 %2029, %v465_v29  }
  0x56   :  { %1107 = vmatpush2.bf16.msra.mxu0 %v2134_v19  ;;  %1180 = vmatpush2.bf16.msra.mxu1 %v2137_v20  ;;  %v2146_v19 = vld [vmem:[#allocation2 + $0x2d8] ss:$12 sps:$4 sm:$0xff]  }
  0x57   :  { %1937 = vmatprep.subr.bf16.mxu0 %v2140_v21  ;;  %1977 = vmatprep.subr.bf16.mxu1 %v2142_v22 }
  0x59   :  { %1472 = vperm.xlu1 %2028, %v464_v24   ;;  %1484 = vperm.xlu0 %2029, %v467_v30  }
  0x5d   :  { %1480 = vperm.xlu1 %2028, %v466_v26   ;;  %2030 = vset.pattern.permute.xlu0 %v2200_v33 }
  0x5e   :  { %1567 = vperm.xlu0 %2030, %v461_v25  }
  0x61   :  { %1488 = vperm.xlu1 %2028, %v468_v28  }
  0x62   :  { %1579 = vperm.xlu0 %2030, %v464_v24  }
  0x65   :  { %2031 = vset.pattern.permute.xlu1 %v2200_v33 }
  0x66   :  { %1571 = vperm.xlu1 %2031, %v462_v27   ;;  %1587 = vperm.xlu0 %2030, %v466_v26  }
  0x6a   :  { %1575 = vperm.xlu1 %2031, %v463_v23   ;;  %1595 = vperm.xlu0 %2030, %v468_v28  }
  0x6e   :  { %1583 = vperm.xlu1 %2031, %v465_v29   ;;  %v2145_v29 = vld [vmem:[#allocation2 + $0x98] ss:$12 sps:$4 sm:$0xff]  }
  0x72   :  { %1591 = vperm.xlu1 %2031, %v467_v30  }
  0xd8   :  { %v173_v41 = vpop.f32.mrf.mxu0  ;;  %v246_v42 = vpop.f32.mrf.mxu1 }
  0xd9   :  { %v174_v55 = vadd.f32 %v173_v41, %v2363_v45  ;;  %v247_v56 = vadd.f32 %v246_v42, %v2366_v46 }
  0xda   :  { %v175_v47 = vpop.f32.mrf.mxu0  ;;  %v248_v48 = vpop.f32.mrf.mxu1 }
  0xdb   :  { %v176_v51 = vadd.f32 %v175_v47, %v2357_v43  ;;  %v249_v52 = vadd.f32 %v248_v48, %v2360_v44  ;;  %v285_v5 = vmax.f32 %v174_v55, 0.0  ;;  %v287_v6 = vmax.f32 %v247_v56, 0.0  ;;  %v2149_v55 = vld [vmem:[#allocation2 + $0x80] ss:$12 sps:$4 sm:$0xff]  }
  0xdc   :  { %v177_v49 = vpop.f32.mrf.mxu0  ;;  %v250_v50 = vpop.f32.mrf.mxu1  ;;  %v2150_v56 = vld [vmem:[#allocation2 + $0x2c0] ss:$12 sps:$4 sm:$0xff]  }
  0xdd   :  { %v178_v53 = vadd.f32 %v177_v49, %v2363_v45  ;;  %v251_v54 = vadd.f32 %v250_v50, %v2366_v46  ;;  %v286_v1 = vmax.f32 %v176_v51, 0.0  ;;  %v288_v2 = vmax.f32 %v249_v52, 0.0 }
  0xde   :  { %v179_v57 = vpop.f32.mrf.mxu0  ;;  %v252_v58 = vpop.f32.mrf.mxu1 }
  0xdf   :  { %v180_v59 = vadd.f32 %v179_v57, %v2357_v43  ;;  %v253_v60 = vadd.f32 %v252_v58, %v2360_v44  ;;  %v289_v61 = vmax.f32 %v178_v53, 0.0  ;;  %v291_v62 = vmax.f32 %v251_v54, 0.0 }
  0xe0   :  { %v183_v63 = vpop.f32.mrf.mxu0  ;;  %v256_v0 = vpop.f32.mrf.mxu1 }
  0xe1   :  { %v290_v3 = vmax.f32 %v180_v59, 0.0  ;;  %v292_v4 = vmax.f32 %v253_v60, 0.0  ;;  %v2380_v13 = vpack.c.bf16 %v289_v61, %v285_v5  ;;  %v2382_v14 = vpack.c.bf16 %v291_v62, %v287_v6  ;;  %v2151_v62 = vld [vmem:[#allocation2 + $0x200] ss:$12 sps:$4 sm:$0xff]  }
  0xe2   :  { %v185_v7 = vpop.f32.mrf.mxu0  ;;  %v258_v8 = vpop.f32.mrf.mxu1  ;;  %v184_v23 = vadd.f32 %v183_v63, %v2363_v45  ;;  %v257_v24 = vadd.f32 %v256_v0, %v2366_v46  ;;  %v2152_v63 = vld [vmem:[#allocation2 + $0x128] ss:$12 sps:$4 sm:$0xff]  }
  0xe3   :  { %v2376_v9 = vpack.c.bf16 %v290_v3, %v286_v1  ;;  %v2378_v10 = vpack.c.bf16 %v292_v4, %v288_v2  ;;  %v186_v15 = vadd.f32 %v185_v7, %v2357_v43  ;;  %v259_v20 = vadd.f32 %v258_v8, %v2360_v44  ;;  %v2154_v3 = vld [vmem:[#allocation2 + $0x2a8] ss:$12 sps:$4 sm:$0xff]  }
  0xe4   :  { %v187_v16 = vpop.f32.mrf.mxu0  ;;  %v260_v17 = vpop.f32.mrf.mxu1  ;;  %v293_v49 = vmax.f32 %v184_v23, 0.0  ;;  %v295_v50 = vmax.f32 %v257_v24, 0.0 }
  0xe5   :  { %v188_v21 = vadd.f32 %v187_v16, %v2363_v45  ;;  %v261_v22 = vadd.f32 %v260_v17, %v2366_v46  ;;  %1108 = vmatprep.mubr.bf16.mxu0 %v2376_v9  ;;  %1181 = vmatprep.mubr.bf16.mxu1 %v2378_v10  ;;  %v294_v41 = vmax.f32 %v186_v15, 0.0  ;;  %v296_v42 = vmax.f32 %v259_v20, 0.0  ;;  %v2156_v20 = vld [vmem:[#allocation2 + $0x110] ss:$12 sps:$4 sm:$0xff]  }
  0xe6   :  { %v189_v25 = vpop.f32.mrf.mxu0  ;;  %v262_v26 = vpop.f32.mrf.mxu1  ;;  %1109 = vmatmul.mubr.bf16.vlgmr.msra.gmra.mxu0 %v2380_v13  ;;  %1182 = vmatmul.mubr.bf16.vlgmr.msra.gmra.mxu1 %v2382_v14 }
  0xe7   :  { %v190_v27 = vadd.f32 %v189_v25, %v2357_v43  ;;  %v263_v28 = vadd.f32 %v262_v26, %v2360_v44  ;;  %1938 = vmatpush3.bf16.msra.mxu0 %v2141_v11  ;;  %1978 = vmatpush3.bf16.msra.mxu1 %v2143_v12  ;;  %v297_v30 = vmax.f32 %v188_v21, 0.0  ;;  %v299_v31 = vmax.f32 %v261_v22, 0.0  ;;  %v2153_v12 = vld [vmem:[#allocation2 + $0x68] ss:$12 sps:$4 sm:$0xff]  }
  0xe8   :  { %v193_v32 = vpop.f32.mrf.mxu0  ;;  %v266_v33 = vpop.f32.mrf.mxu1  ;;  %1939 = vmatprep.subr.bf16.mxu0 %v2144_v18  ;;  %1979 = vmatprep.subr.bf16.mxu1 %v2146_v19  ;;  %v2155_v19 = vld [vmem:[#allocation2 + $0x1e8] ss:$12 sps:$4 sm:$0xff]  }
  0xe9   :  { %v298_v47 = vmax.f32 %v190_v27, 0.0  ;;  %v300_v48 = vmax.f32 %v263_v28, 0.0  ;;  %v2400_v57 = vpack.c.bf16 %v297_v30, %v293_v49  ;;  %v2402_v58 = vpack.c.bf16 %v299_v31, %v295_v50  ;;  %v2157_v31 = vld [vmem:[#allocation2 + $0x50] ss:$12 sps:$4 sm:$0xff]  }
  0xea   :  { %v195_v51 = vpop.f32.mrf.mxu0  ;;  %v268_v52 = vpop.f32.mrf.mxu1  ;;  %v194_v4 = vadd.f32 %v193_v32, %v2363_v45  ;;  %v267_v5 = vadd.f32 %v266_v33, %v2366_v46  ;;  %v2158_v32 = vld [vmem:[#allocation2 + $0x290] ss:$12 sps:$4 sm:$0xff]  }
  0xeb   :  { %v2396_v53 = vpack.c.bf16 %v298_v47, %v294_v41  ;;  %v2398_v54 = vpack.c.bf16 %v300_v48, %v296_v42  ;;  %1940 = vmatpush3.bf16.msra.mxu0 %v2145_v29  ;;  %v196_v59 = vadd.f32 %v195_v51, %v2357_v43  ;;  %1980 = vmatpush3.bf16.msra.mxu1 %v2147_v34  ;;  %v2159_v47 = vld [vmem:[#allocation2 + $0x1d0] ss:$12 sps:$4 sm:$0xff]   ;;  %v2160_v48 = vld [vmem:[#allocation2 + $0xf8] ss:$12 sps:$4 sm:$0xff]  }
  0xec   :  { %v197_v60 = vpop.f32.mrf.mxu0  ;;  %v270_v61 = vpop.f32.mrf.mxu1  ;;  %1941 = vmatprep.subr.bf16.mxu0 %v2148_v40  ;;  %v269_v0 = vadd.f32 %v268_v52, %v2360_v44  ;;  %1981 = vmatprep.subr.bf16.mxu1 %v2150_v56  ;;  %v301_v25 = vmax.f32 %v194_v4, 0.0  ;;  %v303_v26 = vmax.f32 %v267_v5, 0.0  ;;  %v2162_v52 = vld [vmem:[#allocation2 + $0x278] ss:$12 sps:$4 sm:$0xff]  }
  0xed   :  { %v198_v1 = vadd.f32 %v197_v60, %v2363_v45  ;;  %v271_v2 = vadd.f32 %v270_v61, %v2366_v46  ;;  %1118 = vmatprep.mubr.bf16.mxu0 %v2396_v53  ;;  %1191 = vmatprep.mubr.bf16.mxu1 %v2398_v54  ;;  %v302_v21 = vmax.f32 %v196_v59, 0.0 }
  0xee   :  { %v199_v6 = vpop.f32.mrf.mxu0  ;;  %v272_v7 = vpop.f32.mrf.mxu1  ;;  %1119 = vmatmul.mubr.bf16.gmra.mxu0 %v2400_v57  ;;  %1192 = vmatmul.mubr.bf16.gmra.mxu1 %v2402_v58  ;;  %v304_v22 = vmax.f32 %v269_v0, 0.0 }
  0xef   :  { %v200_v8 = vadd.f32 %v199_v6, %v2357_v43  ;;  %v273_v11 = vadd.f32 %v272_v7, %v2360_v44  ;;  %1942 = vmatpush3.bf16.msra.mxu0 %v2149_v55  ;;  %v305_v15 = vmax.f32 %v198_v1, 0.0  ;;  %v307_v16 = vmax.f32 %v271_v2, 0.0  ;;  %1982 = vmatpush3.bf16.msra.mxu1 %v2151_v62  ;;  %v2164_v2 = vld [vmem:[#allocation2 + $0xe0] ss:$12 sps:$4 sm:$0xff]  }
  0xf0   :  { %v203_v17 = vpop.f32.mrf.mxu0  ;;  %v276_v18 = vpop.f32.mrf.mxu1  ;;  %1943 = vmatprep.subr.bf16.mxu0 %v2152_v63  ;;  %1983 = vmatprep.subr.bf16.mxu1 %v2154_v3  ;;  %v2161_v63 = vld [vmem:[#allocation2 + $0x38] ss:$12 sps:$4 sm:$0xff]  }
  0xf1   :  { %v306_v23 = vmax.f32 %v200_v8, 0.0  ;;  %v308_v24 = vmax.f32 %v273_v11, 0.0  ;;  %v2420_v33 = vpack.c.bf16 %v305_v15, %v301_v25  ;;  %v2422_v34 = vpack.c.bf16 %v307_v16, %v303_v26  ;;  %v2166_v11 = vld [vmem:[#allocation2 + $0x260] ss:$12 sps:$4 sm:$0xff]  }
  0xf2   :  { %v205_v27 = vpop.f32.mrf.mxu0  ;;  %v278_v28 = vpop.f32.mrf.mxu1  ;;  %v204_v55 = vadd.f32 %v203_v17, %v2363_v45  ;;  %v277_v56 = vadd.f32 %v276_v18, %v2366_v46  ;;  %v2167_v16 = vld [vmem:[#allocation2 + $0x1a0] ss:$12 sps:$4 sm:$0xff]   ;;  %v2168_v17 = vld [vmem:[#allocation2 + $0xc8] ss:$12 sps:$4 sm:$0xff]  }
  0xf3   :  { %v2416_v29 = vpack.c.bf16 %v306_v23, %v302_v21  ;;  %v2418_v30 = vpack.c.bf16 %v308_v24, %v304_v22  ;;  %1944 = vmatpush3.bf16.msra.mxu0 %v2153_v12  ;;  %v206_v40 = vadd.f32 %v205_v27, %v2357_v43  ;;  %1984 = vmatpush3.bf16.msra.mxu1 %v2155_v19  ;;  %v2170_v18 = vld [vmem:[#allocation2 + $0x248] ss:$12 sps:$4 sm:$0xff]  }
  0xf4   :  { %v207_v41 = vpop.f32.mrf.mxu0  ;;  %v280_v42 = vpop.f32.mrf.mxu1  ;;  %1945 = vmatprep.subr.bf16.mxu0 %v2156_v20  ;;  %v279_v49 = vadd.f32 %v278_v28, %v2360_v44  ;;  %1985 = vmatprep.subr.bf16.mxu1 %v2158_v32  ;;  %v309_v6 = vmax.f32 %v204_v55, 0.0  ;;  %v311_v7 = vmax.f32 %v277_v56, 0.0  ;;  %v2169_v19 = vld [vmem:[#allocation2 + $0x8] ss:$12 sps:$4 sm:$0xff]  }
  0xf5   :  { %v208_v50 = vadd.f32 %v207_v41, %v2363_v45  ;;  %v281_v51 = vadd.f32 %v280_v42, %v2366_v46  ;;  %1128 = vmatprep.mubr.bf16.mxu0 %v2416_v29  ;;  %1201 = vmatprep.mubr.bf16.mxu1 %v2418_v30  ;;  %v2163_v45 = vld [vmem:[#allocation2 + $0x1b8] ss:$12 sps:$4 sm:$0xff]   ;;  %v310_v46 = vmax.f32 %v206_v40, 0.0  ;;  %v2171_v20 = vld [vmem:[#allocation2 + $0x188] ss:$12 sps:$4 sm:$0xff]  }
  0xf6   :  { %v209_v59 = vpop.f32.mrf.mxu0  ;;  %v282_v60 = vpop.f32.mrf.mxu1  ;;  %1129 = vmatmul.mubr.bf16.gmra.mxu0 %v2420_v33  ;;  %1202 = vmatmul.mubr.bf16.gmra.mxu1 %v2422_v34  ;;  %v312_v3 = vmax.f32 %v279_v49, 0.0  ;;  %v2467_v28 = vld [vmem:[%s3027_s5 + $0x8] sm:$0xf] }
  0xf7   :  { %v210_v61 = vadd.f32 %v209_v59, %v2357_v43  ;;  %v283_v62 = vadd.f32 %v282_v60, %v2360_v44  ;;  %1946 = vmatpush3.bf16.msra.mxu0 %v2157_v31  ;;  %v313_v0 = vmax.f32 %v208_v50, 0.0  ;;  %v315_v1 = vmax.f32 %v281_v51, 0.0  ;;  %1986 = vmatpush3.bf16.msra.mxu1 %v2159_v47  ;;  %v2165_v44 = vld [vmem:[#allocation2 + $0x20] ss:$12 sps:$4 sm:$0xff]  }
  0xf8   :  { %1947 = vmatprep.subr.bf16.mxu0 %v2160_v48  ;;  %1987 = vmatprep.subr.bf16.mxu1 %v2162_v52  ;;  %v1390_v31 = vsub.s32 5, %v2339_v35  ;;  %v524_v32 = vrot.slane %v2467_v28, %v2348_v38  ;;  %v1395_v42 = vrot.slane %v2467_v28, %v2342_v36  ;;  %v1502_v49 = vrot.slane %v2467_v28, %v2351_v39 }
  0xf9   :  { %v314_v4 = vmax.f32 %v210_v61, 0.0  ;;  %v316_v5 = vmax.f32 %v283_v62, 0.0  ;;  %v329_v12 = vpack.c.bf16 %v313_v0, %v309_v6  ;;  %v331_v15 = vpack.c.bf16 %v315_v1, %v311_v7 }
  0xfa   :  { %v519_v51 = vsub.s32 4, %v2339_v35  ;;  %v539_v52 = vrot.slane %v524_v32, %v2348_v38  ;;  %v1410_v60 = vrot.slane %v1395_v42, %v2342_v36 }
  0xfb   :  { %v330_v8 = vpack.c.bf16 %v314_v4, %v310_v46  ;;  %v332_v43 = vpack.c.bf16 %v316_v5, %v312_v3  ;;  %1948 = vmatpush3.bf16.msra.mxu0 %v2161_v63  ;;  %1988 = vmatpush3.bf16.msra.mxu1 %v2163_v45  ;;  %v2506_v63 = vrot.slane %v1502_v49, %v2351_v39 }
  0xfc   :  { %1949 = vmatprep.subr.bf16.mxu0 %v2164_v2  ;;  %1989 = vmatprep.subr.bf16.mxu1 %v2166_v11 }
  0xfd   :  { %1138 = vmatprep.mubr.bf16.mxu0 %v330_v8  ;;  %1211 = vmatprep.mubr.bf16.mxu1 %v332_v43 }
  0xfe   :  { %1139 = vmatmul.mubr.bf16.gmra.mxu0 %v329_v12  ;;  %1212 = vmatmul.mubr.bf16.gmra.mxu1 %v331_v15 }
  0xff   :  { %1950 = vmatpush3.bf16.msra.mxu0 %v2165_v44  ;;  %1254 = vmatprep.mubr.bf16.mxu0 %v2376_v9  ;;  %v2448_v9 = vpop.permute.xlu1 %483 }
 0x100   :  { %1990 = vmatpush3.bf16.msra.mxu1 %v2167_v16  ;;  %1319 = vmatprep.mubr.bf16.mxu1 %v2378_v10  ;;  %v2510_v45 = vmul.f32 %v539_v52, %v2448_v9 }
 0x101   :  { %1951 = vmatprep.subr.bf16.mxu0 %v2168_v17  ;;  %1991 = vmatprep.subr.bf16.mxu1 %v2170_v18 }
 0x102   :  { %3032 = vst [vmem:[#allocation5_spill] sm:$0xff] %v2510_v45 }
 0x103   :  { %1952 = vmatpush3.bf16.msra.mxu0 %v2169_v19  ;;  %v2450_v10 = vpop.permute.xlu1 %488 }
 0x104   :  { %1992 = vmatpush3.bf16.msra.mxu1 %v2171_v20  ;;  %v2513_v2 = vmul.f32 %v539_v52, %v2450_v10 }
 0x106   :  { %1255 = vmatmul.mubr.bf16.vlgmr.msra.gmra.mxu0 %v2380_v13  ;;  %v2452_v13 = vpop.permute.xlu0 %473  ;;  %3033 = vst [vmem:[#allocation6_spill] sm:$0xff] %v2513_v2 }
 0x107   :  { %1320 = vmatmul.mubr.bf16.vlgmr.msra.gmra.mxu1 %v2382_v14  ;;  %1262 = vmatprep.mubr.bf16.mxu0 %v2396_v53  ;;  %v2454_v14 = vpop.permute.xlu1 %498  ;;  %v2516_v46 = vmul.f32 %v539_v52, %v2452_v13 }
 0x108   :  { %1327 = vmatprep.mubr.bf16.mxu1 %v2398_v54  ;;  %v2522_v4 = vmul.f32 %v539_v52, %v2454_v14 }
 0x109   :  { %3034 = vst [vmem:[#allocation7_spill] sm:$0xff] %v2516_v46 }
 0x10a   :  { %v2456_v53 = vpop.permute.xlu0 %478  ;;  %3035 = vst [vmem:[#allocation8_spill] sm:$0xff] %v2522_v4 }
 0x10b   :  { %v2458_v54 = vpop.permute.xlu1 %508  ;;  %v2525_v5 = vmul.f32 %v539_v52, %v2456_v53 }
 0x10c   :  { %v2528_v6 = vmul.f32 %v539_v52, %v2458_v54 }
 0x10d   :  { %3036 = vst [vmem:[#allocation9_spill] sm:$0xff] %v2525_v5 }
 0x10e   :  { %1263 = vmatmul.mubr.bf16.gmra.mxu0 %v2400_v57  ;;  %v2460_v57 = vpop.permute.xlu0 %493  ;;  %3037 = vst [vmem:[#allocation10_spill] sm:$0xff] %v2528_v6 }
 0x10f   :  { %1328 = vmatmul.mubr.bf16.gmra.mxu1 %v2402_v58  ;;  %1270 = vmatprep.mubr.bf16.mxu0 %v2416_v29  ;;  %v1358_v58 = vpop.permute.xlu1 %1357 }
 0x110   :  { %1335 = vmatprep.mubr.bf16.mxu1 %v2418_v30  ;;  %v2474_v30 = vld [vmem:[%s3027_s5] sm:$0xff] }
 0x111   :  { %v516_v40 = vrot.slane %v2474_v30, %v2348_v38  ;;  %v1387_v41 = vrot.slane %v2474_v30, %v2342_v36  ;;  %v1391_v47 = vrot.slane %v2474_v30, %v1390_v31  ;;  %v1494_v48 = vrot.slane %v2474_v30, %v2351_v39 }
 0x112   :  { %v2462_v21 = vpop.permute.xlu0 %503  ;;  %v520_v1 = vrot.slane %v2474_v30, %v519_v51 }
 0x113   :  { %v1362_v22 = vpop.permute.xlu1 %1361  ;;  %v2497_v56 = vrot.slane %v516_v40, %v2348_v38  ;;  %v1402_v59 = vrot.slane %v1387_v41, %v2342_v36  ;;  %v1406_v61 = vrot.slane %v1391_v47, %v2342_v36  ;;  %v2503_v62 = vrot.slane %v1494_v48, %v2351_v39 }
 0x114   :  { %v2549_v18 = vrot.slane %v520_v1, %v2348_v38  ;;  %v2551_v19 = vmul.f32 %v1410_v60, %v1362_v22 }
 0x115   :  { %v2535_v44 = vmul.f32 %v1402_v59, %v1358_v58  ;;  %v2537_v11 = vmul.f32 %v1406_v61, %v1358_v58  ;;  %v2544_v16 = vmul.f32 %v1402_v59, %v1362_v22  ;;  %v2546_v17 = vmul.f32 %v1406_v61, %v1362_v22 }
 0x116   :  { %1271 = vmatmul.mubr.bf16.gmra.mxu0 %v2420_v33  ;;  %v1354_v23 = vpop.permute.xlu0 %1353  ;;  %v1497_v33 = vsub.s32 6, %v2339_v35  ;;  %3041 = vst [vmem:[#allocation14_spill] sm:$0xff] %v2551_v19 }
 0x117   :  { %1336 = vmatmul.mubr.bf16.gmra.mxu1 %v2422_v34  ;;  %1278 = vmatprep.mubr.bf16.mxu0 %v330_v8  ;;  %v1370_v24 = vpop.permute.xlu1 %1369  ;;  %v540_v8 = vmul.f32 %v2497_v56, %v2452_v13  ;;  %v2553_v20 = vmul.f32 %v1402_v59, %v1354_v23  ;;  %v2555_v31 = vmul.f32 %v1406_v61, %v1354_v23 }
 0x118   :  { %1343 = vmatprep.mubr.bf16.mxu1 %v332_v43  ;;  %v1498_v55 = vrot.slane %v2474_v30, %v1497_v33  ;;  %v2533_v43 = vmul.f32 %v539_v52, %v2460_v57  ;;  %v2557_v32 = vmul.f32 %v1410_v60, %v1354_v23  ;;  %v2559_v33 = vmul.f32 %v1402_v59, %v1370_v24 }
 0x119   :  { %v2561_v40 = vmul.f32 %v1406_v61, %v1370_v24 }
 0x11a   :  { %v1366_v25 = vpop.permute.xlu0 %1365  ;;  %v2519_v3 = vrot.slane %v1498_v55, %v2351_v39  ;;  %3038 = vst [vmem:[#allocation11_spill] sm:$0xff] %v2533_v43  ;;  %3042 = vst [vmem:[#allocation15_spill] sm:$0xff] %v2557_v32  ;;  %v547_v32 = vmul.f32 %v2549_v18, %v2448_v9 }
 0x11b   :  { %v1378_v26 = vpop.permute.xlu1 %1377  ;;  %v2565_v41 = vmul.f32 %v1402_v59, %v1366_v25  ;;  %v2567_v47 = vmul.f32 %v1406_v61, %v1366_v25  ;;  %v2569_v48 = vmul.f32 %v1410_v60, %v1366_v25 }
 0x11c   :  { %v2571_v22 = vmul.f32 %v1402_v59, %v1378_v26  ;;  %v2573_v49 = vmul.f32 %v1406_v61, %v1378_v26  ;;  %v2575_v51 = vmul.f32 %v1410_v60, %v1378_v26 }
 0x11d   :  { %3044 = vst [vmem:[#allocation17_spill] sm:$0xff] %v2569_v48  ;;  %v1604_v48 = vsub.s32 7, %v2339_v35 }
 0x11e   :  { %1279 = vmatmul.mubr.bf16.gmra.mxu0 %v329_v12  ;;  %v1374_v27 = vpop.permute.xlu0 %1373  ;;  %v2540_v12 = vmul.f32 %v539_v52, %v2462_v21  ;;  %3045 = vst [vmem:[#allocation18_spill] sm:$0xff] %v2571_v22  ;;  %3046 = vst [vmem:[#allocation19_spill] sm:$0xff] %v2573_v49  ;;  %v549_v22 = vmul.f32 %v2497_v56, %v2450_v10 }
 0x11f   :  { %1344 = vmatmul.mubr.bf16.gmra.mxu1 %v331_v15  ;;  %v2469_v29 = vpop.permute.xlu1 %1460  ;;  %v2542_v15 = vmul.f32 %v1410_v60, %v1358_v58  ;;  %v2563_v58 = vmul.f32 %v1410_v60, %v1370_v24  ;;  %3047 = vst [vmem:[#allocation20_spill] sm:$0xff] %v2575_v51  ;;  %v2577_v23 = vmul.f32 %v1402_v59, %v1374_v27 }
 0x120   :  { %3039 = vst [vmem:[#allocation12_spill] sm:$0xff] %v2540_v12  ;;  %v2579_v52 = vmul.f32 %v1406_v61, %v1374_v27  ;;  %v541_v24 = vmul.f32 %v2549_v18, %v2452_v13  ;;  %v2583_v1 = vmul.f32 %v1410_v60, %v1374_v27  ;;  %v2593_v26 = vmul.f32 %v2503_v62, %v2469_v29 }
 0x121   :  { %3040 = vst [vmem:[#allocation13_spill] sm:$0xff] %v2542_v15  ;;  %3043 = vst [vmem:[#allocation16_spill] sm:$0xff] %v2563_v58  ;;  %v2597_v51 = vmul.f32 %v2519_v3, %v2469_v29  ;;  %v2601_v13 = vmul.f32 %v2506_v63, %v2469_v29 }
 0x122   :  { %v1382_v34 = vpop.permute.xlu0 %1381  ;;  %3048 = vst [vmem:[#allocation21_spill] sm:$0xff] %v2577_v23  ;;  %3049 = vst [vmem:[#allocation22_spill] sm:$0xff] %v2579_v52 }
 0x123   :  { %v2491_v50 = vpop.permute.xlu1 %1468  ;;  %3050 = vst [vmem:[#allocation23_spill] sm:$0xff] %v2583_v1  ;;  %v2585_v6 = vmul.f32 %v1402_v59, %v1382_v34  ;;  %v2587_v25 = vmul.f32 %v1406_v61, %v1382_v34  ;;  %v2589_v12 = vmul.f32 %v1410_v60, %v1382_v34  ;;  %3054 = vst [vmem:[#allocation27_spill] sm:$0xff] %v2601_v13 }
 0x124   :  { %v2608_v34 = vmul.f32 %v2503_v62, %v2491_v50  ;;  %v2612_v59 = vmul.f32 %v2519_v3, %v2491_v50  ;;  %v2622_v1 = vmul.f32 %v2506_v63, %v2491_v50  ;;  %v1601_v50 = vrot.slane %v2474_v30, %v2345_v37 }
 0x125   :  { %3051 = vst [vmem:[#allocation24_spill] sm:$0xff] %v2585_v6  ;;  %3052 = vst [vmem:[#allocation25_spill] sm:$0xff] %v2587_v25  ;;  %v544_v6 = vmul.f32 %v2549_v18, %v2456_v53  ;;  %v546_v13 = vmul.f32 %v2497_v56, %v2448_v9  ;;  %v2665_v9 = vmul.f32 %v2497_v56, %v2454_v14 }
 0x126   :  { %v1465_v0 = vpop.permute.xlu0 %1464  ;;  %3053 = vst [vmem:[#allocation26_spill] sm:$0xff] %v2589_v12  ;;  %3056 = vst [vmem:[#allocation29_spill] sm:$0xff] %v2622_v1 }
 0x127   :  { %v1473_v7 = vpop.permute.xlu1 %1472  ;;  %v2604_v27 = vmul.f32 %v2503_v62, %v1465_v0  ;;  %v2615_v60 = vmul.f32 %v2519_v3, %v1465_v0  ;;  %v2618_v61 = vmul.f32 %v2506_v63, %v1465_v0 }
 0x128   :  { %v2636_v1 = vmul.f32 %v2503_v62, %v1473_v7  ;;  %v2639_v35 = vmul.f32 %v2519_v3, %v1473_v7 }
 0x129   :  { %3055 = vst [vmem:[#allocation28_spill] sm:$0xff] %v2618_v61 }
 0x12a   :  { %v1477_v42 = vpop.permute.xlu0 %1476 }
 0x12b   :  { %v1481_v55 = vpop.permute.xlu1 %1480  ;;  %v2628_v2 = vmul.f32 %v2503_v62, %v1477_v42  ;;  %v2631_v19 = vmul.f32 %v2519_v3, %v1477_v42 }
 0x12d   :  { %3057 = vst [vmem:[#allocation30_spill] sm:$0xff] %v2631_v19 }
 0x12e   :  { %v1485_v25 = vpop.permute.xlu0 %1484 }
 0x12f   :  { %v1489_v45 = vpop.permute.xlu1 %1488 }
 0x130   :  { %v2714_v23 = vmul.f32 %v2519_v3, %v1489_v45 }
 0x132   :  { %3069 = vst [vmem:[#allocation42_spill] sm:$0xff] %v2714_v23 }
 0x1a6   :  { %v1110_v4 = vpop.f32.mrf.mxu0  ;;  %v1183_v58 = vpop.f32.mrf.mxu1 }
 0x1a7   :  { %v1111_v0 = vadd.f32 %v1110_v4, %v540_v8  ;;  %v2647_v4 = vmul.f32 %v2506_v63, %v1473_v7 }
 0x1a8   :  { %v1112_v12 = vpop.f32.mrf.mxu0  ;;  %v1185_v29 = vpop.f32.mrf.mxu1 }
 0x1a9   :  { %v1113_v43 = vadd.f32 %v1112_v12, %v541_v24  ;;  %v2642_v12 = vmul.f32 %v2506_v63, %v1477_v42  ;;  %v543_v24 = vmul.f32 %v2497_v56, %v2456_v53  ;;  %3059 = vst [vmem:[#allocation32_spill] sm:$0xff] %v2647_v4  ;;  %v2658_v53 = vmul.f32 %v2549_v18, %v2450_v10  ;;  %v1568_v10 = vpop.permute.xlu0 %1567 }
 0x1aa   :  { %v1114_v61 = vpop.f32.mrf.mxu0  ;;  %v1187_v49 = vpop.f32.mrf.mxu1  ;;  %v1184_v7 = vadd.f32 %v1183_v58, %v1111_v0  ;;  %v2661_v4 = vrot.slane %v1601_v50, %v2345_v37  ;;  %v2676_v58 = vmul.f32 %v2497_v56, %v2458_v54  ;;  %v2686_v0 = vmul.f32 %v2506_v63, %v1481_v55 }
 0x1ab   :  { %3058 = vst [vmem:[#allocation31_spill] sm:$0xff] %v2642_v12  ;;  %v1186_v42 = vadd.f32 %v1185_v29, %v1113_v43  ;;  %v1605_v12 = vrot.slane %v2474_v30, %v1604_v48  ;;  %v2669_v43 = vmul.f32 %v2549_v18, %v2454_v14  ;;  %v2672_v30 = vmul.f32 %v2503_v62, %v1481_v55 }
 0x1ac   :  { %v1116_v8 = vpop.f32.mrf.mxu0  ;;  %v1189_v15 = vpop.f32.mrf.mxu1  ;;  %3061 = vst [vmem:[#allocation34_spill] sm:$0xff] %v2676_v58  ;;  %v2680_v48 = vmul.f32 %v2549_v18, %v2458_v54  ;;  %v2683_v29 = vmul.f32 %v2519_v3, %v1481_v55  ;;  %3064 = vst [vmem:[#allocation37_spill] sm:$0xff] %v2686_v0  ;;  %v2689_v14 = vmul.f32 %v2503_v62, %v1485_v25  ;;  %v2703_v55 = vld [vmem:[%s3028_s6] sm:$0x7] }
 0x1ad   :  { %v1117_v5 = vadd.f32 %v1116_v8, %v544_v6  ;;  %3060 = vst [vmem:[#allocation33_spill] sm:$0xff] %v2672_v30  ;;  %v1115_v6 = vadd.f32 %v1114_v61, %v543_v24  ;;  %v1609_v61 = vrot.slane %v2467_v28, %v2345_v37  ;;  %v2694_v8 = vmul.f32 %v2519_v3, %v1485_v25 }
 0x1ae   :  { %v1120_v52 = vpop.f32.mrf.mxu0  ;;  %v1193_v46 = vpop.f32.mrf.mxu1  ;;  %3062 = vst [vmem:[#allocation35_spill] sm:$0xff] %v2680_v48  ;;  %3063 = vst [vmem:[#allocation36_spill] sm:$0xff] %v2683_v29  ;;  %v1436_v54 = vadd.f32 %v2555_v31, %v1186_v42  ;;  %v2698_v48 = vrot.slane %v1605_v12, %v2345_v37  ;;  %v1435_v29 = vadd.f32 %v2553_v20, %v1184_v7 }
 0x1af   :  { %3065 = vst [vmem:[#allocation38_spill] sm:$0xff] %v2689_v14  ;;  %3066 = vst [vmem:[#allocation39_spill] sm:$0xff] %v2694_v8  ;;  %v1190_v0 = vadd.f32 %v1189_v15, %v1117_v5  ;;  %v1572_v14 = vpop.permute.xlu1 %1571  ;;  %v2707_v28 = vmul.f32 %v2506_v63, %v1485_v25  ;;  %v1625_v58 = vmul.f32 %v2661_v4, %v1568_v10 }
 0x1b0   :  { %v1122_v50 = vpop.f32.mrf.mxu0  ;;  %v1195_v24 = vpop.f32.mrf.mxu1  ;;  %v1188_v42 = vadd.f32 %v1187_v49, %v1115_v6  ;;  %v2711_v12 = vmul.f32 %v2503_v62, %v1489_v45  ;;  %v1121_v19 = vadd.f32 %v1120_v52, %v546_v13  ;;  %v2717_v5 = vmul.f32 %v2506_v63, %v1489_v45  ;;  %v2738_v45 = vld [vmem:[%s3029_s7] sm:$0x7] }
 0x1b1   :  { %3067 = vst [vmem:[#allocation40_spill] sm:$0xff] %v2707_v28  ;;  %v1123_v8 = vadd.f32 %v1122_v50, %v547_v32  ;;  %v2720_v15 = vrot.slane %v1609_v61, %v2345_v37  ;;  %v2724_v20 = vrot.slane %v2703_v55, %v2348_v38  ;;  %v2728_v32 = vrot.slane %v2703_v55, %v2342_v36 }
 0x1b2   :  { %v1124_v30 = vpop.f32.mrf.mxu0  ;;  %v1197_v31 = vpop.f32.mrf.mxu1  ;;  %3068 = vst [vmem:[#allocation41_spill] sm:$0xff] %v2711_v12  ;;  %3070 = vst [vmem:[#allocation43_spill] sm:$0xff] %v2717_v5  ;;  %v1543_v3 = vadd.f32 %v2597_v51, %v1436_v54  ;;  %v1626_v52 = vmul.f32 %v2698_v48, %v1568_v10  ;;  %v1439_v63 = vadd.f32 %v2537_v11, %v1190_v0 }
 0x1b3   :  { %3071 = vst [vmem:[#allocation44_spill] sm:$0xff] %v2720_v15  ;;  %v552_v37 = vmul.f32 %v2497_v56, %v2460_v57  ;;  %v1542_v25 = vadd.f32 %v2593_v26, %v1435_v29  ;;  %v1628_v13 = vmul.f32 %v2661_v4, %v1572_v14  ;;  %v1196_v7 = vadd.f32 %v1195_v24, %v1123_v8  ;;  %v1576_v54 = vpop.permute.xlu1 %1575 }
 0x1b4   :  { %v1126_v62 = vpop.f32.mrf.mxu0  ;;  %v1199_v49 = vpop.f32.mrf.mxu1  ;;  %v553_v51 = vmul.f32 %v2549_v18, %v2460_v57  ;;  %v1438_v11 = vadd.f32 %v2535_v44, %v1188_v42  ;;  %v1194_v0 = vadd.f32 %v1193_v46, %v1121_v19  ;;  %v1125_v50 = vadd.f32 %v1124_v30, %v549_v22 }
 0x1b5   :  { %v2747_v5 = vmul.f32 %v2497_v56, %v2462_v21  ;;  %v2750_v28 = vmul.f32 %v2720_v15, %v1568_v10  ;;  %v1629_v26 = vmul.f32 %v2698_v48, %v1572_v14  ;;  %v2755_v8 = vmul.f32 %v2549_v18, %v2462_v21  ;;  %v1580_v22 = vpop.permute.xlu0 %1579 }
 0x1b6   :  { %v1130_v6 = vpop.f32.mrf.mxu0  ;;  %v1203_v61 = vpop.f32.mrf.mxu1  ;;  %v2759_v57 = vrot.slane %v2738_v45, %v2348_v38  ;;  %v1650_v46 = vadd.f32 %v1626_v52, %v1543_v3  ;;  %v1546_v44 = vadd.f32 %v2615_v60, %v1439_v63  ;;  %v2763_v56 = vmul.f32 %v2720_v15, %v1572_v14 }
 0x1b7   :  { %v1127_v19 = vadd.f32 %v1126_v62, %v2658_v53  ;;  %v1649_v30 = vadd.f32 %v1625_v58, %v1542_v25  ;;  %v1442_v10 = vadd.f32 %v2546_v17, %v1196_v7  ;;  %v1631_v42 = vmul.f32 %v2661_v4, %v1576_v54  ;;  %v1584_v63 = vpop.permute.xlu1 %1583 }
 0x1b8   :  { %v1132_v29 = vpop.f32.mrf.mxu0  ;;  %v1205_v24 = vpop.f32.mrf.mxu1  ;;  %v2770_v38 = vrot.slane %v2738_v45, %v2342_v36  ;;  %v1545_v3 = vadd.f32 %v2604_v27, %v1438_v11  ;;  %v1441_v60 = vadd.f32 %v2544_v16, %v1194_v0  ;;  %v1198_v14 = vadd.f32 %v1197_v31, %v1125_v50 }
 0x1b9   :  { %v1131_v52 = vadd.f32 %v1130_v6, %v552_v37  ;;  %v1632_v53 = vmul.f32 %v2698_v48, %v1576_v54  ;;  %v2776_v58 = vmul.f32 %v2720_v15, %v1576_v54  ;;  %v1634_v17 = vmul.f32 %v2661_v4, %v1580_v22  ;;  %v1588_v37 = vpop.permute.xlu0 %1587 }
 0x1ba   :  { %v1134_v21 = vpop.f32.mrf.mxu0  ;;  %v1207_v18 = vpop.f32.mrf.mxu1  ;;  %v2780_v62 = vmul.f32 %v2698_v48, %v1580_v22  ;;  %v1691_v27 = vadd.f32 %v2728_v32, %v1650_v46  ;;  %v1653_v7 = vadd.f32 %v1629_v26, %v1546_v44  ;;  %v1200_v16 = vadd.f32 %v1199_v49, %v1127_v19 }
 0x1bb   :  { %v1133_v31 = vadd.f32 %v1132_v29, %v553_v51  ;;  %v1690_v6 = vadd.f32 %v2724_v20, %v1649_v30  ;;  %v1549_v11 = vadd.f32 %v2612_v59, %v1442_v10  ;;  %v2788_v0 = vmul.f32 %v2720_v15, %v1580_v22 }
 0x1bc   :  { %v1136_v25 = vpop.f32.mrf.mxu0  ;;  %v2782_v36 = vpop.f32.mrf.mxu1  ;;  %v2791_v50 = vmul.f32 %v2661_v4, %v1584_v63  ;;  %v1548_v12 = vadd.f32 %v2608_v34, %v1441_v60  ;;  %v1652_v46 = vadd.f32 %v1628_v13, %v1545_v3  ;;  %v1444_v49 = vadd.f32 %v2565_v41, %v1198_v14 }
 0x1bd   :  { %v1204_v51 = vadd.f32 %v1203_v61, %v1131_v52  ;;  %v2798_v26 = vmul.f32 %v2698_v48, %v1584_v63  ;;  %v2801_v59 = vmul.f32 %v2720_v15, %v1584_v63  ;;  %v2804_v29 = vmul.f32 %v2661_v4, %v1588_v37  ;;  %v1592_v61 = vpop.permute.xlu1 %1591  ;;  %v2813_v30 = vpop.permute.xlu0 %1595 }
 0x1be   :  { %v1140_v54 = vpop.f32.mrf.mxu0  ;;  %v2793_v23 = vpop.f32.mrf.mxu1  ;;  %v2807_v44 = vmul.f32 %v2698_v48, %v1588_v37  ;;  %v1694_v34 = vadd.f32 %v2728_v32, %v1653_v7  ;;  %v1445_v41 = vadd.f32 %v2567_v47, %v1200_v16  ;;  %v1206_v13 = vadd.f32 %v1205_v24, %v1133_v31 }
 0x1bf   :  { %3072 = vst [vmem:[#allocation45_spill] sm:$0xff] %v2801_v59  ;;  %v1715_v10 = vmax.f32 %v1691_v27, 0.0  ;;  %v1656_v3 = vadd.f32 %v1632_v53, %v1549_v11  ;;  %v1135_v60 = vadd.f32 %v1134_v21, %v2665_v9  ;;  %v2817_v14 = vmul.f32 %v2720_v15, %v1588_v37 }
 0x1c0   :  { %v1142_v19 = vpop.f32.mrf.mxu0  ;;  %v2809_v22 = vpop.f32.mrf.mxu1  ;;  %v1714_v59 = vmax.f32 %v1690_v6, 0.0  ;;  %v1693_v7 = vadd.f32 %v2724_v20, %v1652_v46  ;;  %v1551_v47 = vadd.f32 %v2636_v1, %v1444_v49  ;;  %v1655_v24 = vadd.f32 %v1631_v42, %v1548_v12 }
 0x1c1   :  { %v1447_v16 = vadd.f32 %v2559_v33, %v1204_v51  ;;  %v2827_v27 = vmul.f32 %v2661_v4, %v1592_v61  ;;  %v2830_v9 = vmul.f32 %v2698_v48, %v1592_v61  ;;  %v2833_v21 = vmul.f32 %v2720_v15, %v1592_v61 }
 0x1c2   :  { %v2819_v52 = vpop.f32.mrf.mxu0  ;;  %v2821_v63 = vpop.f32.mrf.mxu1  ;;  %v2841_v37 = vmul.f32 %v2661_v4, %v2813_v30  ;;  %v1552_v1 = vadd.f32 %v2639_v35, %v1445_v41  ;;  %v1448_v33 = vadd.f32 %v2561_v40, %v1206_v13  ;;  %v1756_v12 = vmul.f32 %v2770_v38, %v1715_v10 }
 0x1c3   :  { %3073 = vst [vmem:[#allocation46_spill] sm:$0xff] %v2833_v21  ;;  %v1718_v42 = vmax.f32 %v1694_v34, 0.0  ;;  %v1697_v6 = vadd.f32 %v2728_v32, %v1656_v3  ;;  %v1208_v11 = vadd.f32 %v1207_v18, %v1135_v60  ;;  %v1137_v46 = vadd.f32 %v1136_v25, %v2669_v43 }
 0x1c4   :  { %v2835_v53 = vpop.f32.mrf.mxu0  ;;  %v2837_v31 = vpop.f32.mrf.mxu1  ;;  %v1755_v51 = vmul.f32 %v2759_v57, %v1714_v59  ;;  %v1696_v61 = vadd.f32 %v2724_v20, %v1655_v24  ;;  %v1554_v4 = vadd.f32 %v2628_v2, %v1447_v16  ;;  %v1658_v15 = vadd.f32 %v1634_v17, %v1551_v47  ;;  %v3074_v17 = vld [vmem:[#allocation30_spill] sm:$0xff] }
 0x1c5   :  { %v1717_v35 = vmax.f32 %v1693_v7, 0.0  ;;  %v1141_v40 = vadd.f32 %v1140_v54, %v2747_v5  ;;  %v2854_v34 = vmul.f32 %v2698_v48, %v2813_v30  ;;  %v2858_v43 = vrot.slane %v2703_v55, %v2351_v39  ;;  %v3075_v48 = vld [vmem:[#allocation21_spill] sm:$0xff] }
 0x1c6   :  { %v1953_v49 = vpop.f32.mrf.mxu0  ;;  %v2862_v18 = vrot.slane %v2738_v45, %v2351_v39  ;;  %v1659_v2 = vadd.f32 %v2780_v62, %v1552_v1  ;;  %v1555_v25 = vadd.f32 %v3074_v17, %v1448_v33  ;;  %v2866_v13 = vadd.f32 %v1756_v12, %v1755_v51  ;;  %v3076_v1 = vld [vmem:[#allocation7_spill] sm:$0xff]  ;;  %v3078_v51 = vld [vmem:[#allocation22_spill] sm:$0xff] }
 0x1c7   :  { %v1993_v21 = vpop.f32.mrf.mxu1  ;;  %v1759_v5 = vmul.f32 %v2770_v38, %v1718_v42  ;;  %v1450_v54 = vadd.f32 %v3075_v48, %v1208_v11  ;;  %v1210_v10 = vadd.f32 %v2782_v36, %v1137_v46  ;;  %v1721_v60 = vmax.f32 %v1697_v6, 0.0 }
 0x1c8   :  { %v1954_v41 = vpop.f32.mrf.mxu0  ;;  %v1699_v7 = vadd.f32 %v2724_v20, %v1658_v15  ;;  %v1661_v39 = vadd.f32 %v2791_v50, %v1554_v4  ;;  %v1758_v62 = vmul.f32 %v2759_v57, %v1717_v35  ;;  %v1720_v47 = vmax.f32 %v1696_v61, 0.0  ;;  %v3077_v50 = vld [vmem:[#allocation33_spill] sm:$0xff] }
 0x1c9   :  { %v1994_v59 = vpop.f32.mrf.mxu1  ;;  %v1955_v3 = vadd.f32 %v1954_v41, %v1953_v49  ;;  %v1214_v24 = vadd.f32 %v2793_v23, %v1141_v40  ;;  %v1143_v16 = vadd.f32 %v1142_v19, %v2755_v8  ;;  %v1700_v36 = vadd.f32 %v2728_v32, %v1659_v2  ;;  %v3080_v2 = vld [vmem:[#allocation18_spill] sm:$0xff] }
 0x1ca   :  { %v1956_v55 = vpop.f32.mrf.mxu0  ;;  %v1995_v12 = vadd.f32 %v1994_v59, %v1993_v21  ;;  %v1662_v6 = vadd.f32 %v2798_v26, %v1555_v25  ;;  %v2879_v46 = vadd.f32 %v1759_v5, %v1758_v62  ;;  %v1557_v49 = vadd.f32 %v3077_v50, %v1450_v54  ;;  %v3079_v21 = vld [vmem:[#allocation9_spill] sm:$0xff]  ;;  %v3081_v59 = vld [vmem:[#allocation15_spill] sm:$0xff]  ;;  %v3083_v62 = vld [vmem:[#allocation36_spill] sm:$0xff] }
 0x1cb   :  { %v1996_v45 = vpop.f32.mrf.mxu1  ;;  %v1257_v33 = vadd.f32 %v1955_v3, %v3076_v1  ;;  %v1451_v61 = vadd.f32 %v3078_v51, %v1210_v10  ;;  %v1762_v8 = vmul.f32 %v2770_v38, %v1721_v60  ;;  %v2885_v19 = vadd.f32 %v2724_v20, %v1661_v39  ;;  %v3082_v3 = vld [vmem:[#allocation34_spill] sm:$0xff] }
 0x1cc   :  { %v1957_v42 = vpop.f32.mrf.mxu0  ;;  %v1761_v26 = vmul.f32 %v2759_v57, %v1720_v47  ;;  %v1453_v17 = vadd.f32 %v3080_v2, %v1214_v24  ;;  %v1216_v25 = vadd.f32 %v2809_v22, %v1143_v16  ;;  %v1723_v54 = vmax.f32 %v1699_v7, 0.0  ;;  %v3084_v24 = vld [vmem:[#allocation27_spill] sm:$0xff] }
 0x1cd   :  { %v1958_v11 = vadd.f32 %v1957_v42, %v1956_v55  ;;  %v1997_v15 = vpop.f32.mrf.mxu1  ;;  %v1322_v4 = vadd.f32 %v1995_v12, %v1257_v33  ;;  %v2893_v10 = vadd.f32 %v2728_v32, %v1662_v6  ;;  %v1145_v55 = vadd.f32 %v2819_v52, %v3082_v3  ;;  %v3085_v12 = vld [vmem:[#allocation13_spill] sm:$0xff]  ;;  %v3087_v52 = vld [vmem:[#allocation38_spill] sm:$0xff] }
 0x1ce   :  { %v1959_v23 = vpop.f32.mrf.mxu0  ;;  %v1998_v40 = vadd.f32 %v1997_v15, %v1996_v45  ;;  %v1558_v1 = vadd.f32 %v3083_v62, %v1451_v61  ;;  %v1664_v47 = vadd.f32 %v2804_v29, %v1557_v49  ;;  %v2900_v16 = vadd.f32 %v1762_v8, %v1761_v26  ;;  %v3086_v42 = vld [vmem:[#allocation5_spill] sm:$0xff] }
 0x1cf   :  { %v1260_v35 = vadd.f32 %v1958_v11, %v3079_v21  ;;  %v1999_v41 = vpop.f32.mrf.mxu1  ;;  %v1437_v5 = vadd.f32 %v3081_v59, %v1322_v4  ;;  %v1724_v50 = vmax.f32 %v1700_v36, 0.0  ;;  %v1560_v51 = vadd.f32 %v3087_v52, %v1453_v17  ;;  %v3088_v4 = vld [vmem:[#allocation19_spill] sm:$0xff] }
 0x1d0   :  { %v1960_v48 = vpop.f32.mrf.mxu0  ;;  %v3089_v21 = vld [vmem:[#allocation35_spill] sm:$0xff]  ;;  %v1218_v8 = vadd.f32 %v2821_v63, %v1145_v55  ;;  %v2913_v36 = vadd.f32 %v2724_v20, %v1664_v47 }
 0x1d1   :  { %v1325_v60 = vadd.f32 %v1998_v40, %v1260_v35  ;;  %v1961_v39 = vadd.f32 %v1960_v48, %v1959_v23  ;;  %v2000_v45 = vpop.f32.mrf.mxu1  ;;  %v1544_v33 = vadd.f32 %v3084_v24, %v1437_v5  ;;  %v1454_v23 = vadd.f32 %v3088_v4, %v1216_v25  ;;  %v3090_v35 = vld [vmem:[#allocation28_spill] sm:$0xff]  ;;  %v3091_v5 = vld [vmem:[#allocation14_spill] sm:$0xff]  ;;  %v3094_v24 = vld [vmem:[#allocation29_spill] sm:$0xff] }
 0x1d2   :  { %v1962_v22 = vpop.f32.mrf.mxu0  ;;  %v2001_v11 = vadd.f32 %v2000_v45, %v1999_v41  ;;  %v1147_v61 = vadd.f32 %v2835_v53, %v3089_v21  ;;  %v1665_v41 = vadd.f32 %v2807_v44, %v1558_v1  ;;  %v1764_v53 = vmul.f32 %v2759_v57, %v1723_v54 }
 0x1d3   :  { %v1440_v7 = vadd.f32 %v3085_v12, %v1325_v60  ;;  %v1265_v6 = vadd.f32 %v1961_v39, %v3086_v42  ;;  %v2002_v15 = vpop.f32.mrf.mxu1  ;;  %v1651_v49 = vadd.f32 %v2750_v28, %v1544_v33  ;;  %v3092_v28 = vld [vmem:[#allocation6_spill] sm:$0xff]  ;;  %v3093_v39 = vld [vmem:[#allocation39_spill] sm:$0xff]  ;;  %v1765_v47 = vmul.f32 %v2770_v38, %v1724_v50  ;;  %v3095_v42 = vld [vmem:[#allocation24_spill] sm:$0xff] }
 0x1d4   :  { %v1963_v29 = vpop.f32.mrf.mxu0  ;;  %v1561_v45 = vadd.f32 %v3093_v39, %v1454_v23  ;;  %v1220_v44 = vadd.f32 %v2837_v31, %v1147_v61  ;;  %v3096_v31 = vld [vmem:[#allocation17_spill] sm:$0xff]  ;;  %v3097_v23 = vld [vmem:[#allocation11_spill] sm:$0xff] }
 0x1d5   :  { %v1547_v40 = vadd.f32 %v3090_v35, %v1440_v7  ;;  %v1330_v26 = vadd.f32 %v2001_v11, %v1265_v6  ;;  %v1964_v2 = vadd.f32 %v1963_v29, %v1962_v22  ;;  %v2003_v59 = vpop.f32.mrf.mxu1  ;;  %v1692_v25 = vadd.f32 %v2858_v43, %v1651_v49  ;;  %v3098_v35 = vld [vmem:[#allocation25_spill] sm:$0xff] }
 0x1d6   :  { %v1965_v17 = vpop.f32.mrf.mxu0  ;;  %v2004_v63 = vadd.f32 %v2003_v59, %v2002_v15  ;;  %v1456_v6 = vadd.f32 %v3095_v42, %v1218_v8  ;;  %v1667_v11 = vadd.f32 %v2827_v27, %v1560_v51  ;;  %v2932_v49 = vadd.f32 %v2728_v32, %v1665_v41 }
 0x1d7   :  { %v1443_v48 = vadd.f32 %v3091_v5, %v1330_v26  ;;  %v1268_v3 = vadd.f32 %v1964_v2, %v3092_v28  ;;  %v2005_v55 = vpop.f32.mrf.mxu1  ;;  %v1654_v60 = vadd.f32 %v2763_v56, %v1547_v40  ;;  %v1716_v1 = vmax.f32 %v1692_v25, 0.0  ;;  %v3099_v26 = vld [vmem:[#allocation32_spill] sm:$0xff] }
 0x1d8   :  { %v1966_v62 = vpop.f32.mrf.mxu0  ;;  %v1457_v40 = vadd.f32 %v3098_v35, %v1220_v44  ;;  %v1791_v51 = vadd.f32 %v1765_v47, %v1764_v53  ;;  %v1726_v41 = vmax.f32 %v2885_v19, 0.0  ;;  %v1668_v47 = vadd.f32 %v2830_v9, %v1561_v45  ;;  %v3104_v19 = vld [vmem:[#allocation31_spill] sm:$0xff] }
 0x1d9   :  { %v1550_v33 = vadd.f32 %v3094_v24, %v1443_v48  ;;  %v1333_v22 = vadd.f32 %v2004_v63, %v1268_v3  ;;  %v1967_v54 = vadd.f32 %v1966_v62, %v1965_v17  ;;  %v2006_v12 = vpop.f32.mrf.mxu1  ;;  %v1695_v7 = vadd.f32 %v2858_v43, %v1654_v60  ;;  %v3100_v63 = vld [vmem:[#allocation16_spill] sm:$0xff]  ;;  %v3102_v62 = vld [vmem:[#allocation41_spill] sm:$0xff]  ;;  %v3103_v24 = vld [vmem:[#allocation42_spill] sm:$0xff] }
 0x1da   :  { %v2007_v56 = vadd.f32 %v2006_v12, %v2005_v55  ;;  %v1968_v15 = vpop.f32.mrf.mxu0  ;;  %v1757_v52 = vmul.f32 %v2862_v18, %v1716_v1  ;;  %v1727_v3 = vmax.f32 %v2893_v10, 0.0  ;;  %v1563_v1 = vadd.f32 %v3102_v62, %v1456_v6  ;;  %v3105_v45 = vld [vmem:[#allocation23_spill] sm:$0xff] }
 0x1db   :  { %v1446_v4 = vadd.f32 %v3096_v31, %v1333_v22  ;;  %v1273_v21 = vadd.f32 %v1967_v54, %v3097_v23  ;;  %v2008_v50 = vpop.f32.mrf.mxu1  ;;  %v1719_v61 = vmax.f32 %v1695_v7, 0.0  ;;  %v1657_v29 = vadd.f32 %v2776_v58, %v1550_v33  ;;  %v3106_v31 = vld [vmem:[#allocation12_spill] sm:$0xff] }
 0x1dc   :  { %v1969_v8 = vpop.f32.mrf.mxu0  ;;  %v1780_v27 = vadd.f32 %v2866_v13, %v1757_v52  ;;  %v3101_v13 = vld [vmem:[#allocation8_spill] sm:$0xff]  ;;  %v1564_v33 = vadd.f32 %v3103_v24, %v1457_v40  ;;  %v1768_v9 = vmul.f32 %v2770_v38, %v1727_v3 }
 0x1dd   :  { %v1553_v2 = vadd.f32 %v3099_v26, %v1446_v4  ;;  %v1338_v59 = vadd.f32 %v2007_v56, %v1273_v21  ;;  %v1970_v17 = vadd.f32 %v1969_v8, %v1968_v15  ;;  %v2009_v25 = vpop.f32.mrf.mxu1  ;;  %v1760_v5 = vmul.f32 %v2862_v18, %v1719_v61 }
 0x1de   :  { %v2010_v48 = vadd.f32 %v2009_v25, %v2008_v50  ;;  %1781 = vadd.xlane.f32.xlu1 %v1780_v27  ;;  %v1971_v28 = vpop.f32.mrf.mxu0  ;;  %v1698_v58 = vadd.f32 %v2858_v43, %v1657_v29  ;;  %v3107_v50 = vld [vmem:[#allocation45_spill] sm:$0xff]  ;;  %v1709_v29 = vadd.f32 %v2728_v32, %v1668_v47  ;;  %v1671_v35 = vadd.f32 %v2854_v34, %v1564_v33 }
 0x1df   :  { %v1449_v55 = vadd.f32 %v3100_v63, %v1338_v59  ;;  %v1276_v53 = vadd.f32 %v1970_v17, %v3101_v13  ;;  %v2011_v60 = vpop.f32.mrf.mxu1  ;;  %v1784_v39 = vadd.f32 %v2879_v46, %v1760_v5  ;;  %v1660_v44 = vadd.f32 %v2788_v0, %v1553_v2  ;;  %v3108_v27 = vld [vmem:[#allocation37_spill] sm:$0xff] }
 0x1e0   :  { %v1972_v22 = vpop.f32.mrf.mxu0  ;;  %v1722_v54 = vmax.f32 %v1698_v58, 0.0  ;;  %v1708_v46 = vadd.f32 %v2724_v20, %v1667_v11  ;;  %v1730_v8 = vmax.f32 %v2932_v49, 0.0  ;;  %v1670_v5 = vadd.f32 %v2841_v37, %v1563_v1  ;;  %v3109_v58 = vld [vmem:[#allocation20_spill] sm:$0xff] }
 0x1e1   :  { %v1556_v12 = vadd.f32 %v3104_v19, %v1449_v55  ;;  %v1341_v10 = vadd.f32 %v2010_v48, %v1276_v53  ;;  %v1973_v7 = vadd.f32 %v1972_v22, %v1971_v28  ;;  %v2012_v42 = vpop.f32.mrf.mxu1  ;;  %1785 = vadd.xlane.f32.xlu0 %v1784_v39  ;;  %v1701_v56 = vadd.f32 %v2858_v43, %v1660_v44  ;;  %v3111_v44 = vld [vmem:[#allocation40_spill] sm:$0xff]  ;;  %v3113_v19 = vld [vmem:[#allocation46_spill] sm:$0xff] }
 0x1e2   :  { %v2013_v15 = vadd.f32 %v2012_v42, %v2011_v60  ;;  %v1974_v0 = vpop.f32.mrf.mxu0  ;;  %v1763_v6 = vmul.f32 %v2862_v18, %v1722_v54  ;;  %v1729_v34 = vmax.f32 %v2913_v36, 0.0  ;;  %v1767_v53 = vmul.f32 %v2759_v57, %v1726_v41  ;;  %v3112_v41 = vld [vmem:[#allocation26_spill] sm:$0xff] }
 0x1e3   :  { %v1452_v52 = vadd.f32 %v3105_v45, %v1341_v10  ;;  %v1281_v4 = vadd.f32 %v1973_v7, %v3106_v31  ;;  %v2014_v23 = vpop.f32.mrf.mxu1  ;;  %v1725_v21 = vmax.f32 %v1701_v56, 0.0  ;;  %v1663_v61 = vadd.f32 %v3107_v50, %v1556_v12 }
 0x1e4   :  { %v1975_v40 = vpop.f32.mrf.mxu0  ;;  %v1788_v11 = vadd.f32 %v2900_v16, %v1763_v6  ;;  %v3110_v16 = vld [vmem:[#allocation10_spill] sm:$0xff]  ;;  %v1771_v60 = vmul.f32 %v2770_v38, %v1730_v8  ;;  %v1733_v39 = vmax.f32 %v1709_v29, 0.0  ;;  %v1712_v37 = vadd.f32 %v2728_v32, %v1671_v35  ;;  %v3114_v32 = vld [vmem:[#allocation44_spill] sm:$0xff] }
 0x1e5   :  { %v1559_v26 = vadd.f32 %v3108_v27, %v1452_v52  ;;  %v1346_v2 = vadd.f32 %v2013_v15, %v1281_v4  ;;  %v1976_v59 = vadd.f32 %v1975_v40, %v1974_v0  ;;  %v2015_v17 = vpop.f32.mrf.mxu1  ;;  %v1766_v25 = vmul.f32 %v2862_v18, %v1725_v21  ;;  %v3115_v15 = vld [vmem:[#allocation43_spill] sm:$0xff] }
 0x1e6   :  { %v2016_v48 = vadd.f32 %v2015_v17, %v2014_v23  ;;  %1789 = vadd.xlane.f32.xlu0 %v1788_v11  ;;  %v1704_v28 = vadd.f32 %v2858_v43, %v1663_v61  ;;  %v1795_v24 = vadd.f32 %v1768_v9, %v1767_v53  ;;  %v1711_v33 = vadd.f32 %v2724_v20, %v1670_v5 }
 0x1e7   :  { %v1455_v3 = vadd.f32 %v3109_v58, %v1346_v2  ;;  %v1284_v63 = vadd.f32 %v1976_v59, %v3110_v16  ;;  %v1792_v49 = vadd.f32 %v1791_v51, %v1766_v25  ;;  %v1666_v55 = vadd.f32 %v2817_v14, %v1559_v26 }
 0x1e8   :  { %v1728_v13 = vmax.f32 %v1704_v28, 0.0  ;;  %v1770_v51 = vmul.f32 %v2759_v57, %v1729_v34  ;;  %v1732_v14 = vmax.f32 %v1708_v46, 0.0  ;;  %v1648_v10 = vmul.f32 %v3114_v32, %v2813_v30 }
 0x1e9   :  { %v1562_v62 = vadd.f32 %v3111_v44, %v1455_v3  ;;  %v1349_v1 = vadd.f32 %v2016_v48, %v1284_v63  ;;  %1793 = vadd.xlane.f32.xlu1 %v1792_v49  ;;  %v1707_v36 = vadd.f32 %v2858_v43, %v1666_v55  ;;  %v1774_v56 = vmul.f32 %v2770_v38, %v1733_v39 }
 0x1ea   :  { %v1769_v47 = vmul.f32 %v2862_v18, %v1728_v13  ;;  %v1799_v42 = vadd.f32 %v1771_v60, %v1770_v51  ;;  %v1736_v9 = vmax.f32 %v1712_v37, 0.0  ;;  %v1773_v20 = vmul.f32 %v2759_v57, %v1732_v14 }
 0x1eb   :  { %v1458_v22 = vadd.f32 %v3112_v41, %v1349_v1  ;;  %v1731_v54 = vmax.f32 %v1707_v36, 0.0  ;;  %v1669_v12 = vadd.f32 %v3113_v19, %v1562_v62  ;;  %v1735_v4 = vmax.f32 %v1711_v33, 0.0 }
 0x1ec   :  { %v1796_v7 = vadd.f32 %v1795_v24, %v1769_v47  ;;  %v1803_v23 = vadd.f32 %v1774_v56, %v1773_v20  ;;  %v1777_v50 = vmul.f32 %v2770_v38, %v1736_v9 }
 0x1ed   :  { %v1565_v0 = vadd.f32 %v3115_v15, %v1458_v22  ;;  %v1772_v6 = vmul.f32 %v2862_v18, %v1731_v54  ;;  %v1710_v46 = vadd.f32 %v2858_v43, %v1669_v12  ;;  %v1776_v35 = vmul.f32 %v2759_v57, %v1735_v4 }
 0x1ee   :  { %1797 = vadd.xlane.f32.xlu0 %v1796_v7 }
 0x1ef   :  { %v1800_v45 = vadd.f32 %v1799_v42, %v1772_v6  ;;  %v1734_v52 = vmax.f32 %v1710_v46, 0.0  ;;  %v1672_v31 = vadd.f32 %v1648_v10, %v1565_v0  ;;  %v1807_v11 = vadd.f32 %v1777_v50, %v1776_v35 }
 0x1f1   :  { %1801 = vadd.xlane.f32.xlu1 %v1800_v45  ;;  %v1775_v30 = vmul.f32 %v2862_v18, %v1734_v52  ;;  %v1713_v21 = vadd.f32 %v2858_v43, %v1672_v31 }
 0x1f3   :  { %v1804_v61 = vadd.f32 %v1803_v23, %v1775_v30  ;;  %v1737_v29 = vmax.f32 %v1713_v21, 0.0 }
 0x1f5   :  { %1805 = vadd.xlane.f32.xlu0 %v1804_v61  ;;  %v1778_v40 = vmul.f32 %v2862_v18, %v1737_v29 }
 0x1f7   :  { %v1808_v8 = vadd.f32 %v1807_v11, %v1778_v40 }
 0x1f9   :  { %1809 = vadd.xlane.f32.xlu1 %v1808_v8 }
 0x267   :  { %v1782_v27 = vpop.xlane.xlu1 %1781 }
 0x268   :  { %1812 = vst.msk [vmem:[%s3030_s8] sm:$0xff] %vm1811_vm1, %v1782_v27 }
 0x26a   :  { %v1786_v43 = vpop.xlane.xlu0 %1785 }
 0x26b   :  { %1813 = vst.msk [vmem:[%s3030_s8 + $0x8] sm:$0xff] %vm1811_vm1, %v1786_v43 }
 0x26f   :  { %v1790_v57 = vpop.xlane.xlu0 %1789 }
 0x270   :  { %1814 = vst.msk [vmem:[%s3030_s8 + $0x10] sm:$0xff] %vm1811_vm1, %v1790_v57 }
 0x272   :  { %v1794_v38 = vpop.xlane.xlu1 %1793 }
 0x273   :  { %1815 = vst.msk [vmem:[%s3030_s8 + $0x18] sm:$0xff] %vm1811_vm1, %v1794_v38 }
 0x277   :  { %v1798_v18 = vpop.xlane.xlu0 %1797 }
 0x278   :  { %1816 = vst.msk [vmem:[%s3030_s8 + $0x20] sm:$0xff] %vm1811_vm1, %v1798_v18 }
 0x27a   :  { %v1802_v26 = vpop.xlane.xlu1 %1801 }
 0x27b   :  { %1817 = vst.msk [vmem:[%s3030_s8 + $0x28] sm:$0xff] %vm1811_vm1, %v1802_v26 }
 0x27e   :  { %v1806_v2 = vpop.xlane.xlu0 %1805 }
 0x27f   :  { %1818 = vst.msk [vmem:[%s3030_s8 + $0x30] sm:$0xff] %vm1811_vm1, %v1806_v2 }
 0x282   :  { %v1810_v59 = vpop.xlane.xlu1 %1809 }
 0x283   :  { %1819 = vst.msk [vmem:[%s3030_s8 + $0x38] sm:$0xff] %vm1811_vm1, %v1810_v59 }
 0x284   :  { %1824 = vsyncpa [#allocation3], 1 }

</bundles_post_ra>
